<compile_context>
chip_gen: v7x
topology: tpu7x:2x2x1
jax: 0.10.0
libtpu: 0.0.40
codegen_flags: <defaults>
</compile_context>

<pallas_src>
import functools

import jax
import jax.numpy as jnp
from jax.experimental import pallas as pl
from jax.experimental.pallas import tpu as pltpu


# ---------------------------------------------------------------------------
# Fused bidirectional LSTM layer kernel
# ---------------------------------------------------------------------------
def _bidir_lstm_kernel(x_ref, wih_ref, whh_ref, b_ref, out_ref, h_scr, c_scr):
    """One (direction, time-chunk) grid step of a bidirectional LSTM layer.

    x_ref   : (T_CHUNK, B, Din)  input slab for this chunk (chunk order is
              already reversed for the backward direction via the index_map)
    wih_ref : (Din, 4H) bf16     input->hidden weights, gate order (i, f, o, g)
    whh_ref : (H, 4H)   bf16     hidden->hidden weights
    b_ref   : (1, 4H)   f32      combined bias b_ih + b_hh
    out_ref : (T_CHUNK, B, H)    hidden-state output slab
    h_scr   : (B, H) f32         persistent hidden state (per direction sweep)
    c_scr   : (B, H) f32         persistent cell state
    """
    d = pl.program_id(0)          # 0 = forward sweep, 1 = backward sweep
    g = pl.program_id(1)          # chunk index within this direction's sweep

    @pl.when(g == 0)
    def _():
        h_scr[...] = jnp.zeros_like(h_scr)
        c_scr[...] = jnp.zeros_like(c_scr)

    t_chunk = x_ref.shape[0]
    H = whh_ref.shape[0]

    wih = wih_ref[...]            # (Din, 4H) bf16, resident in VMEM
    whh = whh_ref[...]            # (H, 4H)  bf16
    b = b_ref[...]                # (1, 4H)  f32

    def step(s, carry):
        h, c = carry                                        # f32 (B, H)
        # within-chunk time index: s (fwd) or t_chunk-1-s (bwd)
        tt = s + d * (t_chunk - 1 - 2 * s)
        x_t = x_ref[tt].astype(jnp.bfloat16)                # (B, Din)
        gates = (
            jnp.dot(x_t, wih, preferred_element_type=jnp.float32)
            + jnp.dot(h.astype(jnp.bfloat16), whh,
                      preferred_element_type=jnp.float32)
            + b
        )                                                   # (B, 4H) f32
        # gate order (i, f, o, g): one contiguous sigmoid + one tanh slab.
        ifo = jax.nn.sigmoid(gates[:, : 3 * H])
        g_gate = jnp.tanh(gates[:, 3 * H:])
        c_new = ifo[:, H:2 * H] * c + ifo[:, :H] * g_gate
        h_new = ifo[:, 2 * H:] * jnp.tanh(c_new)
        out_ref[tt] = h_new.astype(out_ref.dtype)
        return h_new, c_new

    h_fin, c_fin = jax.lax.fori_loop(
        0, t_chunk, step, (h_scr[...], c_scr[...]), unroll=True)
    h_scr[...] = h_fin
    c_scr[...] = c_fin


# ---------------------------------------------------------------------------
# Wrapper-side weight prep and per-layer pallas_call
# ---------------------------------------------------------------------------
def _pick_chunk(T, cap=32):
    """Largest divisor of T not exceeding `cap` (keeps the inner unroll small)."""
    best = 1
    for c in range(1, min(T, cap) + 1):
        if T % c == 0:
            best = c
    return best


def _prep_direction(w_ih, w_hh, b_ih, b_hh, H):
    """PyTorch (4H, Din)/(4H, H) weights -> transposed, gate-reordered (i,f,o,g),
    bf16 weights + f32 combined bias."""
    perm = jnp.concatenate([
        jnp.arange(0, 2 * H),            # i, f
        jnp.arange(3 * H, 4 * H),        # o
        jnp.arange(2 * H, 3 * H),        # g (cell)
    ])
    wih_t = jnp.asarray(w_ih, jnp.float32)[perm].T.astype(jnp.bfloat16)   # (Din, 4H)
    whh_t = jnp.asarray(w_hh, jnp.float32)[perm].T.astype(jnp.bfloat16)   # (H, 4H)
    bias = (jnp.asarray(b_ih, jnp.float32)
            + jnp.asarray(b_hh, jnp.float32))[perm].reshape(1, 4 * H)
    return wih_t, whh_t, bias


def _prep_layer(p, H):
    wf, hf, bf = _prep_direction(p["w_ih_f"], p["w_hh_f"], p["b_ih_f"], p["b_hh_f"], H)
    wb, hb, bb = _prep_direction(p["w_ih_b"], p["w_hh_b"], p["b_ih_b"], p["b_hh_b"], H)
    wih_all = jnp.stack([wf, wb])        # (2, Din, 4H) bf16
    whh_all = jnp.stack([hf, hb])        # (2, H, 4H)   bf16
    bias_all = jnp.stack([bf, bb])       # (2, 1, 4H)   f32
    return wih_all, whh_all, bias_all


def _bidir_layer(x, wih_all, whh_all, bias_all, H, t_chunk):
    """x: (T, B, Din) f32 -> (T, B, 2H) f32 (fwd ‖ bwd hidden states)."""
    T, B, Din = x.shape
    nc = T // t_chunk

    grid_spec = pltpu.PrefetchScalarGridSpec(
        num_scalar_prefetch=0,
        grid=(2, nc),
        in_specs=[
            # Forward direction (d=0) reads chunk g; backward (d=1) reads
            # chunk nc-1-g — time reversal is free in the index_map.
            pl.BlockSpec((t_chunk, B, Din),
                         lambda di, gi: (gi + di * (nc - 1 - 2 * gi), 0, 0)),
            pl.BlockSpec((None, Din, 4 * H), lambda di, gi: (di, 0, 0)),
            pl.BlockSpec((None, H, 4 * H), lambda di, gi: (di, 0, 0)),
            pl.BlockSpec((None, 1, 4 * H), lambda di, gi: (di, 0, 0)),
        ],
        out_specs=pl.BlockSpec(
            (None, t_chunk, B, H),
            lambda di, gi: (di, gi + di * (nc - 1 - 2 * gi), 0, 0)),
        scratch_shapes=[
            pltpu.VMEM((B, H), jnp.float32),   # h state
            pltpu.VMEM((B, H), jnp.float32),   # c state
        ],
    )

    out = pl.pallas_call(
        _bidir_lstm_kernel,
        out_shape=jax.ShapeDtypeStruct((2, T, B, H), jnp.float32),
        grid_spec=grid_spec,
        compiler_params=pltpu.CompilerParams(
            # direction axis may run on separate TensorCores (v7x); the time
            # axis carries the recurrence and must stay sequential.
            dimension_semantics=("parallel", "arbitrary"),
            vmem_limit_bytes=32 * 1024 * 1024,
        ),
    )(x, wih_all, whh_all, bias_all)

    # (2, T, B, H) -> (T, B, 2H): forward hidden ‖ backward hidden
    return jnp.concatenate([out[0], out[1]], axis=-1)


def bidirectional_lstm(x, params, hidden_size):
    """Forward pass of BidirectionalLSTM.

    x      : (T, B, in_channels) float32 (time-major, batch_first=False)
    params : list (per layer) of dicts with PyTorch-layout weights
             'w_ih_f','w_hh_f','b_ih_f','b_hh_f','w_ih_b','w_hh_b','b_ih_b','b_hh_b'
    returns (T, B, 2*hidden_size) float32
    """
    T, B, _ = x.shape
    # Pad batch to a multiple of 8 (sublane) once; padded rows are independent.
    B_pad = ((B + 7) // 8) * 8
    out = x.astype(jnp.float32)
    if B_pad != B:
        out = jnp.pad(out, ((0, 0), (0, B_pad - B), (0, 0)))

    t_chunk = _pick_chunk(T)
    for p in params:
        wih_all, whh_all, bias_all = _prep_layer(p, hidden_size)
        out = _bidir_layer(out, wih_all, whh_all, bias_all, hidden_size, t_chunk)

    if B_pad != B:
        out = out[:, :B]
    return out


# ----------------------------------------------------------------------------
# Pure-JAX reference (lax.scan, f32) for the correctness check.
# ----------------------------------------------------------------------------
def _ref_direction(x, w_ih, w_hh, b_ih, b_hh):
    H = w_hh.shape[1]

    def step(carry, x_t):
        h, c = carry
        gates = x_t @ w_ih.T + h @ w_hh.T + b_ih + b_hh
        i = jax.nn.sigmoid(gates[:, 0 * H:1 * H])
        f = jax.nn.sigmoid(gates[:, 1 * H:2 * H])
        g = jnp.tanh(gates[:, 2 * H:3 * H])
        o = jax.nn.sigmoid(gates[:, 3 * H:4 * H])
        c_new = f * c + i * g
        h_new = o * jnp.tanh(c_new)
        return (h_new, c_new), h_new

    B = x.shape[1]
    init = (jnp.zeros((B, H), jnp.float32), jnp.zeros((B, H), jnp.float32))
    _, hs = jax.lax.scan(step, init, x)
    return hs


def _ref_bidir(x, params):
    out = x
    for p in params:
        fwd = _ref_direction(out, p["w_ih_f"], p["w_hh_f"], p["b_ih_f"], p["b_hh_f"])
        bwd = jnp.flip(
            _ref_direction(jnp.flip(out, 0),
                           p["w_ih_b"], p["w_hh_b"], p["b_ih_b"], p["b_hh_b"]), 0)
        out = jnp.concatenate([fwd, bwd], axis=-1)
    return out


def _init_params(key, in_channels, hidden_size, num_layers):
    params = []
    k = 1.0 / jnp.sqrt(hidden_size)
    for layer in range(num_layers):
        d_in = in_channels if layer == 0 else 2 * hidden_size
        p = {}
        for suffix in ("f", "b"):
            key, k1, k2, k3, k4 = jax.random.split(key, 5)
            p[f"w_ih_{suffix}"] = jax.random.uniform(
                k1, (4 * hidden_size, d_in), jnp.float32, -k, k)
            p[f"w_hh_{suffix}"] = jax.random.uniform(
                k2, (4 * hidden_size, hidden_size), jnp.float32, -k, k)
            p[f"b_ih_{suffix}"] = jax.random.uniform(
                k3, (4 * hidden_size,), jnp.float32, -k, k)
            p[f"b_hh_{suffix}"] = jax.random.uniform(
                k4, (4 * hidden_size,), jnp.float32, -k, k)
        params.append(p)
    return params


if __name__ == "__main__":
    T, B = 8, 4
    in_channels, hidden_size, num_layers = 16, 32, 2

    key = jax.random.PRNGKey(0)
    key, kx = jax.random.split(key)
    x = jax.random.normal(kx, (T, B, in_channels), jnp.float32)
    params = _init_params(key, in_channels, hidden_size, num_layers)

    run = jax.jit(functools.partial(bidirectional_lstm, params=params,
                                    hidden_size=hidden_size))
    out = jax.block_until_ready(run(x))

    assert out.shape == (T, B, 2 * hidden_size), out.shape

    ref = jax.block_until_ready(_ref_bidir(x, params))
    # bf16 MXU operands with f32 accumulation -> loosened tolerance vs f32 ref.
    assert jnp.allclose(out, ref, rtol=3e-2, atol=3e-2), (
        float(jnp.max(jnp.abs(out - ref))))

    print("KERNEL_OK")
</pallas_src>

<mosaic_0001>
module attributes {stable_mosaic.version = 11 : i64} {
  func.func @_bidir_lstm_kernel(%arg0: i32, %arg1: i32, %arg2: memref<8x8x16xf32, #tpu.memory_space<vmem>>, %arg3: memref<1x16x128xbf16, #tpu.memory_space<vmem>>, %arg4: memref<1x32x128xbf16, #tpu.memory_space<vmem>>, %arg5: memref<1x1x128xf32, #tpu.memory_space<vmem>>, %arg6: memref<1x8x8x32xf32, #tpu.memory_space<vmem>>, %arg7: memref<8x32xf32, #tpu.memory_space<vmem>>, %arg8: memref<8x32xf32, #tpu.memory_space<vmem>>) attributes {dimension_semantics = [#tpu.dimension_semantics<parallel>, #tpu.dimension_semantics<arbitrary>], iteration_bounds = array<i64: 2, 1>, scalar_prefetch = 0 : i64, scratch_operands = 2 : i64, tpu.core_type = #tpu.core_type<tc>, window_params = [{transform_indices = @transform_0, window_bounds = array<i64: 8, 8, 16>}, {transform_indices = @transform_1, window_bounds = array<i64: 1, 16, 128>}, {transform_indices = @transform_2, window_bounds = array<i64: 1, 32, 128>}, {transform_indices = @transform_3, window_bounds = array<i64: 1, 1, 128>}, {transform_indices = @transform_4, window_bounds = array<i64: 1, 8, 8, 32>}]} {
    %c0_i32 = arith.constant 0 : i32
    %0 = arith.cmpi eq, %arg1, %c0_i32 : i32
    %1 = arith.extui %0 : i1 to i32
    %c0_i32_0 = arith.constant 0 : i32
    %2 = arith.cmpi ne, %1, %c0_i32_0 : i32
    scf.if %2 {
      %cst_97 = arith.constant 0.000000e+00 : f32
      %285 = vector.broadcast %cst_97 : f32 to vector<8x32xf32>
      %c0_98 = arith.constant 0 : index
      %c0_99 = arith.constant 0 : index
      %286 = vector.load %arg7[%c0_98, %c0_99] : memref<8x32xf32, #tpu.memory_space<vmem>>, vector<8x32xf32>
      tpu.vector_store %arg7[%c0_98, %c0_99], %285 {strides = array<i32>} : memref<8x32xf32, #tpu.memory_space<vmem>>, vector<8x32xf32>,
      %cst_100 = arith.constant 0.000000e+00 : f32
      %287 = vector.broadcast %cst_100 : f32 to vector<8x32xf32>
      %c0_101 = arith.constant 0 : index
      %c0_102 = arith.constant 0 : index
      %288 = vector.load %arg8[%c0_101, %c0_102] : memref<8x32xf32, #tpu.memory_space<vmem>>, vector<8x32xf32>
      tpu.vector_store %arg8[%c0_101, %c0_102], %287 {strides = array<i32>} : memref<8x32xf32, #tpu.memory_space<vmem>>, vector<8x32xf32>,
    } else {
    }
    %c0 = arith.constant 0 : index
    %c0_1 = arith.constant 0 : index
    %c0_2 = arith.constant 0 : index
    %3 = vector.load %arg3[%c0, %c0_1, %c0_2] : memref<1x16x128xbf16, #tpu.memory_space<vmem>>, vector<1x16x128xbf16>
    %4 = vector.shape_cast %3 : vector<1x16x128xbf16> to vector<16x128xbf16>
    %c0_3 = arith.constant 0 : index
    %c0_4 = arith.constant 0 : index
    %c0_5 = arith.constant 0 : index
    %5 = vector.load %arg4[%c0_3, %c0_4, %c0_5] : memref<1x32x128xbf16, #tpu.memory_space<vmem>>, vector<1x32x128xbf16>
    %6 = vector.shape_cast %5 : vector<1x32x128xbf16> to vector<32x128xbf16>
    %c0_6 = arith.constant 0 : index
    %c0_7 = arith.constant 0 : index
    %c0_8 = arith.constant 0 : index
    %7 = vector.load %arg5[%c0_6, %c0_7, %c0_8] : memref<1x1x128xf32, #tpu.memory_space<vmem>>, vector<1x1x128xf32>
    %8 = vector.shape_cast %7 : vector<1x1x128xf32> to vector<1x128xf32>
    %c0_9 = arith.constant 0 : index
    %c0_10 = arith.constant 0 : index
    %9 = vector.load %arg7[%c0_9, %c0_10] : memref<8x32xf32, #tpu.memory_space<vmem>>, vector<8x32xf32>
    %c0_11 = arith.constant 0 : index
    %c0_12 = arith.constant 0 : index
    %10 = vector.load %arg8[%c0_11, %c0_12] : memref<8x32xf32, #tpu.memory_space<vmem>>, vector<8x32xf32>
    %c0_i32_13 = arith.constant 0 : i32
    %c2_i32 = arith.constant 2 : i32
    %11 = arith.muli %c2_i32, %c0_i32_13 : i32
    %c7_i32 = arith.constant 7 : i32
    %12 = arith.subi %c7_i32, %11 : i32
    %13 = arith.muli %arg0, %12 : i32
    %14 = arith.addi %c0_i32_13, %13 : i32
    %15 = arith.index_cast %14 : i32 to index
    %c0_14 = arith.constant 0 : index
    %c0_15 = arith.constant 0 : index
    %16 = vector.load %arg2[%15, %c0_14, %c0_15] : memref<8x8x16xf32, #tpu.memory_space<vmem>>, vector<1x8x16xf32>
    %17 = vector.shape_cast %16 : vector<1x8x16xf32> to vector<8x16xf32>
    %18 = arith.truncf %17 : vector<8x16xf32> to vector<8x16xbf16>
    %cst = arith.constant dense<0.000000e+00> : vector<8x128xf32>
    %19 = tpu.matmul %18, %4, %cst {dimension_numbers = #tpu.dot_dimension_numbers<[1], [0], [0], [1], [0, 0, 1, 1], [], []>} : vector<8x16xbf16>, vector<16x128xbf16>, vector<8x128xf32> -> vector<8x128xf32>
    %20 = arith.truncf %9 : vector<8x32xf32> to vector<8x32xbf16>
    %cst_16 = arith.constant dense<0.000000e+00> : vector<8x128xf32>
    %21 = tpu.matmul %20, %6, %cst_16 {dimension_numbers = #tpu.dot_dimension_numbers<[1], [0], [0], [1], [0, 0, 1, 1], [], []>} : vector<8x32xbf16>, vector<32x128xbf16>, vector<8x128xf32> -> vector<8x128xf32>
    %22 = arith.addf %19, %21 : vector<8x128xf32>
    %23 = vector.broadcast %8 : vector<1x128xf32> to vector<8x128xf32>
    %24 = arith.addf %22, %23 : vector<8x128xf32>
    %25 = vector.extract_strided_slice %24 {offsets = [0, 0], sizes = [8, 96], strides = [1, 1]} : vector<8x128xf32> to vector<8x96xf32>
    %26 = arith.negf %25 : vector<8x96xf32>
    %27 = math.exp %26 : vector<8x96xf32>
    %cst_17 = arith.constant 1.000000e+00 : f32
    %28 = vector.broadcast %cst_17 : f32 to vector<8x96xf32>
    %29 = arith.addf %28, %27 : vector<8x96xf32>
    %30 = arith.divf %28, %29 : vector<8x96xf32>
    %31 = vector.extract_strided_slice %24 {offsets = [0, 96], sizes = [8, 32], strides = [1, 1]} : vector<8x128xf32> to vector<8x32xf32>
    %32 = math.tanh %31 : vector<8x32xf32>
    %33 = vector.extract_strided_slice %30 {offsets = [0, 32], sizes = [8, 32], strides = [1, 1]} : vector<8x96xf32> to vector<8x32xf32>
    %34 = arith.mulf %33, %10 : vector<8x32xf32>
    %35 = vector.extract_strided_slice %30 {offsets = [0, 0], sizes = [8, 32], strides = [1, 1]} : vector<8x96xf32> to vector<8x32xf32>
    %36 = arith.mulf %35, %32 : vector<8x32xf32>
    %37 = arith.addf %34, %36 : vector<8x32xf32>
    %38 = vector.extract_strided_slice %30 {offsets = [0, 64], sizes = [8, 32], strides = [1, 1]} : vector<8x96xf32> to vector<8x32xf32>
    %39 = math.tanh %37 : vector<8x32xf32>
    %40 = arith.mulf %38, %39 : vector<8x32xf32>
    %c0_18 = arith.constant 0 : index
    %41 = arith.index_cast %14 : i32 to index
    %c0_19 = arith.constant 0 : index
    %c0_20 = arith.constant 0 : index
    %42 = vector.load %arg6[%c0_18, %41, %c0_19, %c0_20] : memref<1x8x8x32xf32, #tpu.memory_space<vmem>>, vector<1x1x8x32xf32>
    %43 = vector.shape_cast %42 : vector<1x1x8x32xf32> to vector<8x32xf32>
    %44 = vector.shape_cast %40 : vector<8x32xf32> to vector<1x1x8x32xf32>
    tpu.vector_store %arg6[%c0_18, %41, %c0_19, %c0_20], %44 {strides = array<i32>} : memref<1x8x8x32xf32, #tpu.memory_space<vmem>>, vector<1x1x8x32xf32>,
    %c1_i32 = arith.constant 1 : i32
    %c2_i32_21 = arith.constant 2 : i32
    %45 = arith.muli %c2_i32_21, %c1_i32 : i32
    %c7_i32_22 = arith.constant 7 : i32
    %46 = arith.subi %c7_i32_22, %45 : i32
    %47 = arith.muli %arg0, %46 : i32
    %48 = arith.addi %c1_i32, %47 : i32
    %49 = arith.index_cast %48 : i32 to index
    %c0_23 = arith.constant 0 : index
    %c0_24 = arith.constant 0 : index
    %50 = vector.load %arg2[%49, %c0_23, %c0_24] : memref<8x8x16xf32, #tpu.memory_space<vmem>>, vector<1x8x16xf32>
    %51 = vector.shape_cast %50 : vector<1x8x16xf32> to vector<8x16xf32>
    %52 = arith.truncf %51 : vector<8x16xf32> to vector<8x16xbf16>
    %cst_25 = arith.constant dense<0.000000e+00> : vector<8x128xf32>
    %53 = tpu.matmul %52, %4, %cst_25 {dimension_numbers = #tpu.dot_dimension_numbers<[1], [0], [0], [1], [0, 0, 1, 1], [], []>} : vector<8x16xbf16>, vector<16x128xbf16>, vector<8x128xf32> -> vector<8x128xf32>
    %54 = arith.truncf %40 : vector<8x32xf32> to vector<8x32xbf16>
    %cst_26 = arith.constant dense<0.000000e+00> : vector<8x128xf32>
    %55 = tpu.matmul %54, %6, %cst_26 {dimension_numbers = #tpu.dot_dimension_numbers<[1], [0], [0], [1], [0, 0, 1, 1], [], []>} : vector<8x32xbf16>, vector<32x128xbf16>, vector<8x128xf32> -> vector<8x128xf32>
    %56 = arith.addf %53, %55 : vector<8x128xf32>
    %57 = vector.broadcast %8 : vector<1x128xf32> to vector<8x128xf32>
    %58 = arith.addf %56, %57 : vector<8x128xf32>
    %59 = vector.extract_strided_slice %58 {offsets = [0, 0], sizes = [8, 96], strides = [1, 1]} : vector<8x128xf32> to vector<8x96xf32>
    %60 = arith.negf %59 : vector<8x96xf32>
    %61 = math.exp %60 : vector<8x96xf32>
    %cst_27 = arith.constant 1.000000e+00 : f32
    %62 = vector.broadcast %cst_27 : f32 to vector<8x96xf32>
    %63 = arith.addf %62, %61 : vector<8x96xf32>
    %64 = arith.divf %62, %63 : vector<8x96xf32>
    %65 = vector.extract_strided_slice %58 {offsets = [0, 96], sizes = [8, 32], strides = [1, 1]} : vector<8x128xf32> to vector<8x32xf32>
    %66 = math.tanh %65 : vector<8x32xf32>
    %67 = vector.extract_strided_slice %64 {offsets = [0, 32], sizes = [8, 32], strides = [1, 1]} : vector<8x96xf32> to vector<8x32xf32>
    %68 = arith.mulf %67, %37 : vector<8x32xf32>
    %69 = vector.extract_strided_slice %64 {offsets = [0, 0], sizes = [8, 32], strides = [1, 1]} : vector<8x96xf32> to vector<8x32xf32>
    %70 = arith.mulf %69, %66 : vector<8x32xf32>
    %71 = arith.addf %68, %70 : vector<8x32xf32>
    %72 = vector.extract_strided_slice %64 {offsets = [0, 64], sizes = [8, 32], strides = [1, 1]} : vector<8x96xf32> to vector<8x32xf32>
    %73 = math.tanh %71 : vector<8x32xf32>
    %74 = arith.mulf %72, %73 : vector<8x32xf32>
    %c0_28 = arith.constant 0 : index
    %75 = arith.index_cast %48 : i32 to index
    %c0_29 = arith.constant 0 : index
    %c0_30 = arith.constant 0 : index
    %76 = vector.load %arg6[%c0_28, %75, %c0_29, %c0_30] : memref<1x8x8x32xf32, #tpu.memory_space<vmem>>, vector<1x1x8x32xf32>
    %77 = vector.shape_cast %76 : vector<1x1x8x32xf32> to vector<8x32xf32>
    %78 = vector.shape_cast %74 : vector<8x32xf32> to vector<1x1x8x32xf32>
    tpu.vector_store %arg6[%c0_28, %75, %c0_29, %c0_30], %78 {strides = array<i32>} : memref<1x8x8x32xf32, #tpu.memory_space<vmem>>, vector<1x1x8x32xf32>,
    %c2_i32_31 = arith.constant 2 : i32
    %c2_i32_32 = arith.constant 2 : i32
    %79 = arith.muli %c2_i32_32, %c2_i32_31 : i32
    %c7_i32_33 = arith.constant 7 : i32
    %80 = arith.subi %c7_i32_33, %79 : i32
    %81 = arith.muli %arg0, %80 : i32
    %82 = arith.addi %c2_i32_31, %81 : i32
    %83 = arith.index_cast %82 : i32 to index
    %c0_34 = arith.constant 0 : index
    %c0_35 = arith.constant 0 : index
    %84 = vector.load %arg2[%83, %c0_34, %c0_35] : memref<8x8x16xf32, #tpu.memory_space<vmem>>, vector<1x8x16xf32>
    %85 = vector.shape_cast %84 : vector<1x8x16xf32> to vector<8x16xf32>
    %86 = arith.truncf %85 : vector<8x16xf32> to vector<8x16xbf16>
    %cst_36 = arith.constant dense<0.000000e+00> : vector<8x128xf32>
    %87 = tpu.matmul %86, %4, %cst_36 {dimension_numbers = #tpu.dot_dimension_numbers<[1], [0], [0], [1], [0, 0, 1, 1], [], []>} : vector<8x16xbf16>, vector<16x128xbf16>, vector<8x128xf32> -> vector<8x128xf32>
    %88 = arith.truncf %74 : vector<8x32xf32> to vector<8x32xbf16>
    %cst_37 = arith.constant dense<0.000000e+00> : vector<8x128xf32>
    %89 = tpu.matmul %88, %6, %cst_37 {dimension_numbers = #tpu.dot_dimension_numbers<[1], [0], [0], [1], [0, 0, 1, 1], [], []>} : vector<8x32xbf16>, vector<32x128xbf16>, vector<8x128xf32> -> vector<8x128xf32>
    %90 = arith.addf %87, %89 : vector<8x128xf32>
    %91 = vector.broadcast %8 : vector<1x128xf32> to vector<8x128xf32>
    %92 = arith.addf %90, %91 : vector<8x128xf32>
    %93 = vector.extract_strided_slice %92 {offsets = [0, 0], sizes = [8, 96], strides = [1, 1]} : vector<8x128xf32> to vector<8x96xf32>
    %94 = arith.negf %93 : vector<8x96xf32>
    %95 = math.exp %94 : vector<8x96xf32>
    %cst_38 = arith.constant 1.000000e+00 : f32
    %96 = vector.broadcast %cst_38 : f32 to vector<8x96xf32>
    %97 = arith.addf %96, %95 : vector<8x96xf32>
    %98 = arith.divf %96, %97 : vector<8x96xf32>
    %99 = vector.extract_strided_slice %92 {offsets = [0, 96], sizes = [8, 32], strides = [1, 1]} : vector<8x128xf32> to vector<8x32xf32>
    %100 = math.tanh %99 : vector<8x32xf32>
    %101 = vector.extract_strided_slice %98 {offsets = [0, 32], sizes = [8, 32], strides = [1, 1]} : vector<8x96xf32> to vector<8x32xf32>
    %102 = arith.mulf %101, %71 : vector<8x32xf32>
    %103 = vector.extract_strided_slice %98 {offsets = [0, 0], sizes = [8, 32], strides = [1, 1]} : vector<8x96xf32> to vector<8x32xf32>
    %104 = arith.mulf %103, %100 : vector<8x32xf32>
    %105 = arith.addf %102, %104 : vector<8x32xf32>
    %106 = vector.extract_strided_slice %98 {offsets = [0, 64], sizes = [8, 32], strides = [1, 1]} : vector<8x96xf32> to vector<8x32xf32>
    %107 = math.tanh %105 : vector<8x32xf32>
    %108 = arith.mulf %106, %107 : vector<8x32xf32>
    %c0_39 = arith.constant 0 : index
    %109 = arith.index_cast %82 : i32 to index
    %c0_40 = arith.constant 0 : index
    %c0_41 = arith.constant 0 : index
    %110 = vector.load %arg6[%c0_39, %109, %c0_40, %c0_41] : memref<1x8x8x32xf32, #tpu.memory_space<vmem>>, vector<1x1x8x32xf32>
    %111 = vector.shape_cast %110 : vector<1x1x8x32xf32> to vector<8x32xf32>
    %112 = vector.shape_cast %108 : vector<8x32xf32> to vector<1x1x8x32xf32>
    tpu.vector_store %arg6[%c0_39, %109, %c0_40, %c0_41], %112 {strides = array<i32>} : memref<1x8x8x32xf32, #tpu.memory_space<vmem>>, vector<1x1x8x32xf32>,
    %c3_i32 = arith.constant 3 : i32
    %c2_i32_42 = arith.constant 2 : i32
    %113 = arith.muli %c2_i32_42, %c3_i32 : i32
    %c7_i32_43 = arith.constant 7 : i32
    %114 = arith.subi %c7_i32_43, %113 : i32
    %115 = arith.muli %arg0, %114 : i32
    %116 = arith.addi %c3_i32, %115 : i32
    %117 = arith.index_cast %116 : i32 to index
    %c0_44 = arith.constant 0 : index
    %c0_45 = arith.constant 0 : index
    %118 = vector.load %arg2[%117, %c0_44, %c0_45] : memref<8x8x16xf32, #tpu.memory_space<vmem>>, vector<1x8x16xf32>
    %119 = vector.shape_cast %118 : vector<1x8x16xf32> to vector<8x16xf32>
    %120 = arith.truncf %119 : vector<8x16xf32> to vector<8x16xbf16>
    %cst_46 = arith.constant dense<0.000000e+00> : vector<8x128xf32>
    %121 = tpu.matmul %120, %4, %cst_46 {dimension_numbers = #tpu.dot_dimension_numbers<[1], [0], [0], [1], [0, 0, 1, 1], [], []>} : vector<8x16xbf16>, vector<16x128xbf16>, vector<8x128xf32> -> vector<8x128xf32>
    %122 = arith.truncf %108 : vector<8x32xf32> to vector<8x32xbf16>
    %cst_47 = arith.constant dense<0.000000e+00> : vector<8x128xf32>
    %123 = tpu.matmul %122, %6, %cst_47 {dimension_numbers = #tpu.dot_dimension_numbers<[1], [0], [0], [1], [0, 0, 1, 1], [], []>} : vector<8x32xbf16>, vector<32x128xbf16>, vector<8x128xf32> -> vector<8x128xf32>
    %124 = arith.addf %121, %123 : vector<8x128xf32>
    %125 = vector.broadcast %8 : vector<1x128xf32> to vector<8x128xf32>
    %126 = arith.addf %124, %125 : vector<8x128xf32>
    %127 = vector.extract_strided_slice %126 {offsets = [0, 0], sizes = [8, 96], strides = [1, 1]} : vector<8x128xf32> to vector<8x96xf32>
    %128 = arith.negf %127 : vector<8x96xf32>
    %129 = math.exp %128 : vector<8x96xf32>
    %cst_48 = arith.constant 1.000000e+00 : f32
    %130 = vector.broadcast %cst_48 : f32 to vector<8x96xf32>
    %131 = arith.addf %130, %129 : vector<8x96xf32>
    %132 = arith.divf %130, %131 : vector<8x96xf32>
    %133 = vector.extract_strided_slice %126 {offsets = [0, 96], sizes = [8, 32], strides = [1, 1]} : vector<8x128xf32> to vector<8x32xf32>
    %134 = math.tanh %133 : vector<8x32xf32>
    %135 = vector.extract_strided_slice %132 {offsets = [0, 32], sizes = [8, 32], strides = [1, 1]} : vector<8x96xf32> to vector<8x32xf32>
    %136 = arith.mulf %135, %105 : vector<8x32xf32>
    %137 = vector.extract_strided_slice %132 {offsets = [0, 0], sizes = [8, 32], strides = [1, 1]} : vector<8x96xf32> to vector<8x32xf32>
    %138 = arith.mulf %137, %134 : vector<8x32xf32>
    %139 = arith.addf %136, %138 : vector<8x32xf32>
    %140 = vector.extract_strided_slice %132 {offsets = [0, 64], sizes = [8, 32], strides = [1, 1]} : vector<8x96xf32> to vector<8x32xf32>
    %141 = math.tanh %139 : vector<8x32xf32>
    %142 = arith.mulf %140, %141 : vector<8x32xf32>
    %c0_49 = arith.constant 0 : index
    %143 = arith.index_cast %116 : i32 to index
    %c0_50 = arith.constant 0 : index
    %c0_51 = arith.constant 0 : index
    %144 = vector.load %arg6[%c0_49, %143, %c0_50, %c0_51] : memref<1x8x8x32xf32, #tpu.memory_space<vmem>>, vector<1x1x8x32xf32>
    %145 = vector.shape_cast %144 : vector<1x1x8x32xf32> to vector<8x32xf32>
    %146 = vector.shape_cast %142 : vector<8x32xf32> to vector<1x1x8x32xf32>
    tpu.vector_store %arg6[%c0_49, %143, %c0_50, %c0_51], %146 {strides = array<i32>} : memref<1x8x8x32xf32, #tpu.memory_space<vmem>>, vector<1x1x8x32xf32>,
    %c4_i32 = arith.constant 4 : i32
    %c2_i32_52 = arith.constant 2 : i32
    %147 = arith.muli %c2_i32_52, %c4_i32 : i32
    %c7_i32_53 = arith.constant 7 : i32
    %148 = arith.subi %c7_i32_53, %147 : i32
    %149 = arith.muli %arg0, %148 : i32
    %150 = arith.addi %c4_i32, %149 : i32
    %151 = arith.index_cast %150 : i32 to index
    %c0_54 = arith.constant 0 : index
    %c0_55 = arith.constant 0 : index
    %152 = vector.load %arg2[%151, %c0_54, %c0_55] : memref<8x8x16xf32, #tpu.memory_space<vmem>>, vector<1x8x16xf32>
    %153 = vector.shape_cast %152 : vector<1x8x16xf32> to vector<8x16xf32>
    %154 = arith.truncf %153 : vector<8x16xf32> to vector<8x16xbf16>
    %cst_56 = arith.constant dense<0.000000e+00> : vector<8x128xf32>
    %155 = tpu.matmul %154, %4, %cst_56 {dimension_numbers = #tpu.dot_dimension_numbers<[1], [0], [0], [1], [0, 0, 1, 1], [], []>} : vector<8x16xbf16>, vector<16x128xbf16>, vector<8x128xf32> -> vector<8x128xf32>
    %156 = arith.truncf %142 : vector<8x32xf32> to vector<8x32xbf16>
    %cst_57 = arith.constant dense<0.000000e+00> : vector<8x128xf32>
    %157 = tpu.matmul %156, %6, %cst_57 {dimension_numbers = #tpu.dot_dimension_numbers<[1], [0], [0], [1], [0, 0, 1, 1], [], []>} : vector<8x32xbf16>, vector<32x128xbf16>, vector<8x128xf32> -> vector<8x128xf32>
    %158 = arith.addf %155, %157 : vector<8x128xf32>
    %159 = vector.broadcast %8 : vector<1x128xf32> to vector<8x128xf32>
    %160 = arith.addf %158, %159 : vector<8x128xf32>
    %161 = vector.extract_strided_slice %160 {offsets = [0, 0], sizes = [8, 96], strides = [1, 1]} : vector<8x128xf32> to vector<8x96xf32>
    %162 = arith.negf %161 : vector<8x96xf32>
    %163 = math.exp %162 : vector<8x96xf32>
    %cst_58 = arith.constant 1.000000e+00 : f32
    %164 = vector.broadcast %cst_58 : f32 to vector<8x96xf32>
    %165 = arith.addf %164, %163 : vector<8x96xf32>
    %166 = arith.divf %164, %165 : vector<8x96xf32>
    %167 = vector.extract_strided_slice %160 {offsets = [0, 96], sizes = [8, 32], strides = [1, 1]} : vector<8x128xf32> to vector<8x32xf32>
    %168 = math.tanh %167 : vector<8x32xf32>
    %169 = vector.extract_strided_slice %166 {offsets = [0, 32], sizes = [8, 32], strides = [1, 1]} : vector<8x96xf32> to vector<8x32xf32>
    %170 = arith.mulf %169, %139 : vector<8x32xf32>
    %171 = vector.extract_strided_slice %166 {offsets = [0, 0], sizes = [8, 32], strides = [1, 1]} : vector<8x96xf32> to vector<8x32xf32>
    %172 = arith.mulf %171, %168 : vector<8x32xf32>
    %173 = arith.addf %170, %172 : vector<8x32xf32>
    %174 = vector.extract_strided_slice %166 {offsets = [0, 64], sizes = [8, 32], strides = [1, 1]} : vector<8x96xf32> to vector<8x32xf32>
    %175 = math.tanh %173 : vector<8x32xf32>
    %176 = arith.mulf %174, %175 : vector<8x32xf32>
    %c0_59 = arith.constant 0 : index
    %177 = arith.index_cast %150 : i32 to index
    %c0_60 = arith.constant 0 : index
    %c0_61 = arith.constant 0 : index
    %178 = vector.load %arg6[%c0_59, %177, %c0_60, %c0_61] : memref<1x8x8x32xf32, #tpu.memory_space<vmem>>, vector<1x1x8x32xf32>
    %179 = vector.shape_cast %178 : vector<1x1x8x32xf32> to vector<8x32xf32>
    %180 = vector.shape_cast %176 : vector<8x32xf32> to vector<1x1x8x32xf32>
    tpu.vector_store %arg6[%c0_59, %177, %c0_60, %c0_61], %180 {strides = array<i32>} : memref<1x8x8x32xf32, #tpu.memory_space<vmem>>, vector<1x1x8x32xf32>,
    %c5_i32 = arith.constant 5 : i32
    %c2_i32_62 = arith.constant 2 : i32
    %181 = arith.muli %c2_i32_62, %c5_i32 : i32
    %c7_i32_63 = arith.constant 7 : i32
    %182 = arith.subi %c7_i32_63, %181 : i32
    %183 = arith.muli %arg0, %182 : i32
    %184 = arith.addi %c5_i32, %183 : i32
    %185 = arith.index_cast %184 : i32 to index
    %c0_64 = arith.constant 0 : index
    %c0_65 = arith.constant 0 : index
    %186 = vector.load %arg2[%185, %c0_64, %c0_65] : memref<8x8x16xf32, #tpu.memory_space<vmem>>, vector<1x8x16xf32>
    %187 = vector.shape_cast %186 : vector<1x8x16xf32> to vector<8x16xf32>
    %188 = arith.truncf %187 : vector<8x16xf32> to vector<8x16xbf16>
    %cst_66 = arith.constant dense<0.000000e+00> : vector<8x128xf32>
    %189 = tpu.matmul %188, %4, %cst_66 {dimension_numbers = #tpu.dot_dimension_numbers<[1], [0], [0], [1], [0, 0, 1, 1], [], []>} : vector<8x16xbf16>, vector<16x128xbf16>, vector<8x128xf32> -> vector<8x128xf32>
    %190 = arith.truncf %176 : vector<8x32xf32> to vector<8x32xbf16>
    %cst_67 = arith.constant dense<0.000000e+00> : vector<8x128xf32>
    %191 = tpu.matmul %190, %6, %cst_67 {dimension_numbers = #tpu.dot_dimension_numbers<[1], [0], [0], [1], [0, 0, 1, 1], [], []>} : vector<8x32xbf16>, vector<32x128xbf16>, vector<8x128xf32> -> vector<8x128xf32>
    %192 = arith.addf %189, %191 : vector<8x128xf32>
    %193 = vector.broadcast %8 : vector<1x128xf32> to vector<8x128xf32>
    %194 = arith.addf %192, %193 : vector<8x128xf32>
    %195 = vector.extract_strided_slice %194 {offsets = [0, 0], sizes = [8, 96], strides = [1, 1]} : vector<8x128xf32> to vector<8x96xf32>
    %196 = arith.negf %195 : vector<8x96xf32>
    %197 = math.exp %196 : vector<8x96xf32>
    %cst_68 = arith.constant 1.000000e+00 : f32
    %198 = vector.broadcast %cst_68 : f32 to vector<8x96xf32>
    %199 = arith.addf %198, %197 : vector<8x96xf32>
    %200 = arith.divf %198, %199 : vector<8x96xf32>
    %201 = vector.extract_strided_slice %194 {offsets = [0, 96], sizes = [8, 32], strides = [1, 1]} : vector<8x128xf32> to vector<8x32xf32>
    %202 = math.tanh %201 : vector<8x32xf32>
    %203 = vector.extract_strided_slice %200 {offsets = [0, 32], sizes = [8, 32], strides = [1, 1]} : vector<8x96xf32> to vector<8x32xf32>
    %204 = arith.mulf %203, %173 : vector<8x32xf32>
    %205 = vector.extract_strided_slice %200 {offsets = [0, 0], sizes = [8, 32], strides = [1, 1]} : vector<8x96xf32> to vector<8x32xf32>
    %206 = arith.mulf %205, %202 : vector<8x32xf32>
    %207 = arith.addf %204, %206 : vector<8x32xf32>
    %208 = vector.extract_strided_slice %200 {offsets = [0, 64], sizes = [8, 32], strides = [1, 1]} : vector<8x96xf32> to vector<8x32xf32>
    %209 = math.tanh %207 : vector<8x32xf32>
    %210 = arith.mulf %208, %209 : vector<8x32xf32>
    %c0_69 = arith.constant 0 : index
    %211 = arith.index_cast %184 : i32 to index
    %c0_70 = arith.constant 0 : index
    %c0_71 = arith.constant 0 : index
    %212 = vector.load %arg6[%c0_69, %211, %c0_70, %c0_71] : memref<1x8x8x32xf32, #tpu.memory_space<vmem>>, vector<1x1x8x32xf32>
    %213 = vector.shape_cast %212 : vector<1x1x8x32xf32> to vector<8x32xf32>
    %214 = vector.shape_cast %210 : vector<8x32xf32> to vector<1x1x8x32xf32>
    tpu.vector_store %arg6[%c0_69, %211, %c0_70, %c0_71], %214 {strides = array<i32>} : memref<1x8x8x32xf32, #tpu.memory_space<vmem>>, vector<1x1x8x32xf32>,
    %c6_i32 = arith.constant 6 : i32
    %c2_i32_72 = arith.constant 2 : i32
    %215 = arith.muli %c2_i32_72, %c6_i32 : i32
    %c7_i32_73 = arith.constant 7 : i32
    %216 = arith.subi %c7_i32_73, %215 : i32
    %217 = arith.muli %arg0, %216 : i32
    %218 = arith.addi %c6_i32, %217 : i32
    %219 = arith.index_cast %218 : i32 to index
    %c0_74 = arith.constant 0 : index
    %c0_75 = arith.constant 0 : index
    %220 = vector.load %arg2[%219, %c0_74, %c0_75] : memref<8x8x16xf32, #tpu.memory_space<vmem>>, vector<1x8x16xf32>
    %221 = vector.shape_cast %220 : vector<1x8x16xf32> to vector<8x16xf32>
    %222 = arith.truncf %221 : vector<8x16xf32> to vector<8x16xbf16>
    %cst_76 = arith.constant dense<0.000000e+00> : vector<8x128xf32>
    %223 = tpu.matmul %222, %4, %cst_76 {dimension_numbers = #tpu.dot_dimension_numbers<[1], [0], [0], [1], [0, 0, 1, 1], [], []>} : vector<8x16xbf16>, vector<16x128xbf16>, vector<8x128xf32> -> vector<8x128xf32>
    %224 = arith.truncf %210 : vector<8x32xf32> to vector<8x32xbf16>
    %cst_77 = arith.constant dense<0.000000e+00> : vector<8x128xf32>
    %225 = tpu.matmul %224, %6, %cst_77 {dimension_numbers = #tpu.dot_dimension_numbers<[1], [0], [0], [1], [0, 0, 1, 1], [], []>} : vector<8x32xbf16>, vector<32x128xbf16>, vector<8x128xf32> -> vector<8x128xf32>
    %226 = arith.addf %223, %225 : vector<8x128xf32>
    %227 = vector.broadcast %8 : vector<1x128xf32> to vector<8x128xf32>
    %228 = arith.addf %226, %227 : vector<8x128xf32>
    %229 = vector.extract_strided_slice %228 {offsets = [0, 0], sizes = [8, 96], strides = [1, 1]} : vector<8x128xf32> to vector<8x96xf32>
    %230 = arith.negf %229 : vector<8x96xf32>
    %231 = math.exp %230 : vector<8x96xf32>
    %cst_78 = arith.constant 1.000000e+00 : f32
    %232 = vector.broadcast %cst_78 : f32 to vector<8x96xf32>
    %233 = arith.addf %232, %231 : vector<8x96xf32>
    %234 = arith.divf %232, %233 : vector<8x96xf32>
    %235 = vector.extract_strided_slice %228 {offsets = [0, 96], sizes = [8, 32], strides = [1, 1]} : vector<8x128xf32> to vector<8x32xf32>
    %236 = math.tanh %235 : vector<8x32xf32>
    %237 = vector.extract_strided_slice %234 {offsets = [0, 32], sizes = [8, 32], strides = [1, 1]} : vector<8x96xf32> to vector<8x32xf32>
    %238 = arith.mulf %237, %207 : vector<8x32xf32>
    %239 = vector.extract_strided_slice %234 {offsets = [0, 0], sizes = [8, 32], strides = [1, 1]} : vector<8x96xf32> to vector<8x32xf32>
    %240 = arith.mulf %239, %236 : vector<8x32xf32>
    %241 = arith.addf %238, %240 : vector<8x32xf32>
    %242 = vector.extract_strided_slice %234 {offsets = [0, 64], sizes = [8, 32], strides = [1, 1]} : vector<8x96xf32> to vector<8x32xf32>
    %243 = math.tanh %241 : vector<8x32xf32>
    %244 = arith.mulf %242, %243 : vector<8x32xf32>
    %c0_79 = arith.constant 0 : index
    %245 = arith.index_cast %218 : i32 to index
    %c0_80 = arith.constant 0 : index
    %c0_81 = arith.constant 0 : index
    %246 = vector.load %arg6[%c0_79, %245, %c0_80, %c0_81] : memref<1x8x8x32xf32, #tpu.memory_space<vmem>>, vector<1x1x8x32xf32>
    %247 = vector.shape_cast %246 : vector<1x1x8x32xf32> to vector<8x32xf32>
    %248 = vector.shape_cast %244 : vector<8x32xf32> to vector<1x1x8x32xf32>
    tpu.vector_store %arg6[%c0_79, %245, %c0_80, %c0_81], %248 {strides = array<i32>} : memref<1x8x8x32xf32, #tpu.memory_space<vmem>>, vector<1x1x8x32xf32>,
    %c7_i32_82 = arith.constant 7 : i32
    %c2_i32_83 = arith.constant 2 : i32
    %249 = arith.muli %c2_i32_83, %c7_i32_82 : i32
    %c7_i32_84 = arith.constant 7 : i32
    %250 = arith.subi %c7_i32_84, %249 : i32
    %251 = arith.muli %arg0, %250 : i32
    %252 = arith.addi %c7_i32_82, %251 : i32
    %253 = arith.index_cast %252 : i32 to index
    %c0_85 = arith.constant 0 : index
    %c0_86 = arith.constant 0 : index
    %254 = vector.load %arg2[%253, %c0_85, %c0_86] : memref<8x8x16xf32, #tpu.memory_space<vmem>>, vector<1x8x16xf32>
    %255 = vector.shape_cast %254 : vector<1x8x16xf32> to vector<8x16xf32>
    %256 = arith.truncf %255 : vector<8x16xf32> to vector<8x16xbf16>
    %cst_87 = arith.constant dense<0.000000e+00> : vector<8x128xf32>
    %257 = tpu.matmul %256, %4, %cst_87 {dimension_numbers = #tpu.dot_dimension_numbers<[1], [0], [0], [1], [0, 0, 1, 1], [], []>} : vector<8x16xbf16>, vector<16x128xbf16>, vector<8x128xf32> -> vector<8x128xf32>
    %258 = arith.truncf %244 : vector<8x32xf32> to vector<8x32xbf16>
    %cst_88 = arith.constant dense<0.000000e+00> : vector<8x128xf32>
    %259 = tpu.matmul %258, %6, %cst_88 {dimension_numbers = #tpu.dot_dimension_numbers<[1], [0], [0], [1], [0, 0, 1, 1], [], []>} : vector<8x32xbf16>, vector<32x128xbf16>, vector<8x128xf32> -> vector<8x128xf32>
    %260 = arith.addf %257, %259 : vector<8x128xf32>
    %261 = vector.broadcast %8 : vector<1x128xf32> to vector<8x128xf32>
    %262 = arith.addf %260, %261 : vector<8x128xf32>
    %263 = vector.extract_strided_slice %262 {offsets = [0, 0], sizes = [8, 96], strides = [1, 1]} : vector<8x128xf32> to vector<8x96xf32>
    %264 = arith.negf %263 : vector<8x96xf32>
    %265 = math.exp %264 : vector<8x96xf32>
    %cst_89 = arith.constant 1.000000e+00 : f32
    %266 = vector.broadcast %cst_89 : f32 to vector<8x96xf32>
    %267 = arith.addf %266, %265 : vector<8x96xf32>
    %268 = arith.divf %266, %267 : vector<8x96xf32>
    %269 = vector.extract_strided_slice %262 {offsets = [0, 96], sizes = [8, 32], strides = [1, 1]} : vector<8x128xf32> to vector<8x32xf32>
    %270 = math.tanh %269 : vector<8x32xf32>
    %271 = vector.extract_strided_slice %268 {offsets = [0, 32], sizes = [8, 32], strides = [1, 1]} : vector<8x96xf32> to vector<8x32xf32>
    %272 = arith.mulf %271, %241 : vector<8x32xf32>
    %273 = vector.extract_strided_slice %268 {offsets = [0, 0], sizes = [8, 32], strides = [1, 1]} : vector<8x96xf32> to vector<8x32xf32>
    %274 = arith.mulf %273, %270 : vector<8x32xf32>
    %275 = arith.addf %272, %274 : vector<8x32xf32>
    %276 = vector.extract_strided_slice %268 {offsets = [0, 64], sizes = [8, 32], strides = [1, 1]} : vector<8x96xf32> to vector<8x32xf32>
    %277 = math.tanh %275 : vector<8x32xf32>
    %278 = arith.mulf %276, %277 : vector<8x32xf32>
    %c0_90 = arith.constant 0 : index
    %279 = arith.index_cast %252 : i32 to index
    %c0_91 = arith.constant 0 : index
    %c0_92 = arith.constant 0 : index
    %280 = vector.load %arg6[%c0_90, %279, %c0_91, %c0_92] : memref<1x8x8x32xf32, #tpu.memory_space<vmem>>, vector<1x1x8x32xf32>
    %281 = vector.shape_cast %280 : vector<1x1x8x32xf32> to vector<8x32xf32>
    %282 = vector.shape_cast %278 : vector<8x32xf32> to vector<1x1x8x32xf32>
    tpu.vector_store %arg6[%c0_90, %279, %c0_91, %c0_92], %282 {strides = array<i32>} : memref<1x8x8x32xf32, #tpu.memory_space<vmem>>, vector<1x1x8x32xf32>,
    %c8_i32 = arith.constant 8 : i32
    %c0_93 = arith.constant 0 : index
    %c0_94 = arith.constant 0 : index
    %283 = vector.load %arg7[%c0_93, %c0_94] : memref<8x32xf32, #tpu.memory_space<vmem>>, vector<8x32xf32>
    tpu.vector_store %arg7[%c0_93, %c0_94], %278 {strides = array<i32>} : memref<8x32xf32, #tpu.memory_space<vmem>>, vector<8x32xf32>,
    %c0_95 = arith.constant 0 : index
    %c0_96 = arith.constant 0 : index
    %284 = vector.load %arg8[%c0_95, %c0_96] : memref<8x32xf32, #tpu.memory_space<vmem>>, vector<8x32xf32>
    tpu.vector_store %arg8[%c0_95, %c0_96], %275 {strides = array<i32>} : memref<8x32xf32, #tpu.memory_space<vmem>>, vector<8x32xf32>,
    return
  }
  func.func @transform_0(%arg0: i32, %arg1: i32) -> (i32, i32, i32) {
    %c2_i32 = arith.constant 2 : i32
    %0 = arith.muli %c2_i32, %arg1 : i32
    %c0_i32 = arith.constant 0 : i32
    %1 = arith.subi %c0_i32, %0 : i32
    %2 = arith.muli %arg0, %1 : i32
    %3 = arith.addi %arg1, %2 : i32
    %c0_i32_0 = arith.constant 0 : i32
    %c0_i32_1 = arith.constant 0 : i32
    %c0_i32_2 = arith.constant 0 : i32
    return %3, %c0_i32_0, %c0_i32_1 : i32, i32, i32
  }
  func.func @transform_1(%arg0: i32, %arg1: i32) -> (i32, i32, i32) {
    %c0_i32 = arith.constant 0 : i32
    %c0_i32_0 = arith.constant 0 : i32
    %c0_i32_1 = arith.constant 0 : i32
    return %arg0, %c0_i32, %c0_i32_0 : i32, i32, i32
  }
  func.func @transform_2(%arg0: i32, %arg1: i32) -> (i32, i32, i32) {
    %c0_i32 = arith.constant 0 : i32
    %c0_i32_0 = arith.constant 0 : i32
    %c0_i32_1 = arith.constant 0 : i32
    return %arg0, %c0_i32, %c0_i32_0 : i32, i32, i32
  }
  func.func @transform_3(%arg0: i32, %arg1: i32) -> (i32, i32, i32) {
    %c0_i32 = arith.constant 0 : i32
    %c0_i32_0 = arith.constant 0 : i32
    %c0_i32_1 = arith.constant 0 : i32
    return %arg0, %c0_i32, %c0_i32_0 : i32, i32, i32
  }
  func.func @transform_4(%arg0: i32, %arg1: i32) -> (i32, i32, i32, i32) {
    %c2_i32 = arith.constant 2 : i32
    %0 = arith.muli %c2_i32, %arg1 : i32
    %c0_i32 = arith.constant 0 : i32
    %1 = arith.subi %c0_i32, %0 : i32
    %2 = arith.muli %arg0, %1 : i32
    %3 = arith.addi %arg1, %2 : i32
    %c0_i32_0 = arith.constant 0 : i32
    %c0_i32_1 = arith.constant 0 : i32
    %c0_i32_2 = arith.constant 0 : i32
    return %arg0, %3, %c0_i32_0, %c0_i32_1 : i32, i32, i32, i32
  }
}

module attributes {stable_mosaic.version = 11 : i64} {
  func.func @_bidir_lstm_kernel(%arg0: i32, %arg1: i32, %arg2: memref<8x8x64xf32, #tpu.memory_space<vmem>>, %arg3: memref<1x64x128xbf16, #tpu.memory_space<vmem>>, %arg4: memref<1x32x128xbf16, #tpu.memory_space<vmem>>, %arg5: memref<1x1x128xf32, #tpu.memory_space<vmem>>, %arg6: memref<1x8x8x32xf32, #tpu.memory_space<vmem>>, %arg7: memref<8x32xf32, #tpu.memory_space<vmem>>, %arg8: memref<8x32xf32, #tpu.memory_space<vmem>>) attributes {dimension_semantics = [#tpu.dimension_semantics<parallel>, #tpu.dimension_semantics<arbitrary>], iteration_bounds = array<i64: 2, 1>, scalar_prefetch = 0 : i64, scratch_operands = 2 : i64, tpu.core_type = #tpu.core_type<tc>, window_params = [{transform_indices = @transform_0, window_bounds = array<i64: 8, 8, 64>}, {transform_indices = @transform_1, window_bounds = array<i64: 1, 64, 128>}, {transform_indices = @transform_2, window_bounds = array<i64: 1, 32, 128>}, {transform_indices = @transform_3, window_bounds = array<i64: 1, 1, 128>}, {transform_indices = @transform_4, window_bounds = array<i64: 1, 8, 8, 32>}]} {
    %c0_i32 = arith.constant 0 : i32
    %0 = arith.cmpi eq, %arg1, %c0_i32 : i32
    %1 = arith.extui %0 : i1 to i32
    %c0_i32_0 = arith.constant 0 : i32
    %2 = arith.cmpi ne, %1, %c0_i32_0 : i32
    scf.if %2 {
      %cst_97 = arith.constant 0.000000e+00 : f32
      %285 = vector.broadcast %cst_97 : f32 to vector<8x32xf32>
      %c0_98 = arith.constant 0 : index
      %c0_99 = arith.constant 0 : index
      %286 = vector.load %arg7[%c0_98, %c0_99] : memref<8x32xf32, #tpu.memory_space<vmem>>, vector<8x32xf32>
      tpu.vector_store %arg7[%c0_98, %c0_99], %285 {strides = array<i32>} : memref<8x32xf32, #tpu.memory_space<vmem>>, vector<8x32xf32>,
      %cst_100 = arith.constant 0.000000e+00 : f32
      %287 = vector.broadcast %cst_100 : f32 to vector<8x32xf32>
      %c0_101 = arith.constant 0 : index
      %c0_102 = arith.constant 0 : index
      %288 = vector.load %arg8[%c0_101, %c0_102] : memref<8x32xf32, #tpu.memory_space<vmem>>, vector<8x32xf32>
      tpu.vector_store %arg8[%c0_101, %c0_102], %287 {strides = array<i32>} : memref<8x32xf32, #tpu.memory_space<vmem>>, vector<8x32xf32>,
    } else {
    }
    %c0 = arith.constant 0 : index
    %c0_1 = arith.constant 0 : index
    %c0_2 = arith.constant 0 : index
    %3 = vector.load %arg3[%c0, %c0_1, %c0_2] : memref<1x64x128xbf16, #tpu.memory_space<vmem>>, vector<1x64x128xbf16>
    %4 = vector.shape_cast %3 : vector<1x64x128xbf16> to vector<64x128xbf16>
    %c0_3 = arith.constant 0 : index
    %c0_4 = arith.constant 0 : index
    %c0_5 = arith.constant 0 : index
    %5 = vector.load %arg4[%c0_3, %c0_4, %c0_5] : memref<1x32x128xbf16, #tpu.memory_space<vmem>>, vector<1x32x128xbf16>
    %6 = vector.shape_cast %5 : vector<1x32x128xbf16> to vector<32x128xbf16>
    %c0_6 = arith.constant 0 : index
    %c0_7 = arith.constant 0 : index
    %c0_8 = arith.constant 0 : index
    %7 = vector.load %arg5[%c0_6, %c0_7, %c0_8] : memref<1x1x128xf32, #tpu.memory_space<vmem>>, vector<1x1x128xf32>
    %8 = vector.shape_cast %7 : vector<1x1x128xf32> to vector<1x128xf32>
    %c0_9 = arith.constant 0 : index
    %c0_10 = arith.constant 0 : index
    %9 = vector.load %arg7[%c0_9, %c0_10] : memref<8x32xf32, #tpu.memory_space<vmem>>, vector<8x32xf32>
    %c0_11 = arith.constant 0 : index
    %c0_12 = arith.constant 0 : index
    %10 = vector.load %arg8[%c0_11, %c0_12] : memref<8x32xf32, #tpu.memory_space<vmem>>, vector<8x32xf32>
    %c0_i32_13 = arith.constant 0 : i32
    %c2_i32 = arith.constant 2 : i32
    %11 = arith.muli %c2_i32, %c0_i32_13 : i32
    %c7_i32 = arith.constant 7 : i32
    %12 = arith.subi %c7_i32, %11 : i32
    %13 = arith.muli %arg0, %12 : i32
    %14 = arith.addi %c0_i32_13, %13 : i32
    %15 = arith.index_cast %14 : i32 to index
    %c0_14 = arith.constant 0 : index
    %c0_15 = arith.constant 0 : index
    %16 = vector.load %arg2[%15, %c0_14, %c0_15] : memref<8x8x64xf32, #tpu.memory_space<vmem>>, vector<1x8x64xf32>
    %17 = vector.shape_cast %16 : vector<1x8x64xf32> to vector<8x64xf32>
    %18 = arith.truncf %17 : vector<8x64xf32> to vector<8x64xbf16>
    %cst = arith.constant dense<0.000000e+00> : vector<8x128xf32>
    %19 = tpu.matmul %18, %4, %cst {dimension_numbers = #tpu.dot_dimension_numbers<[1], [0], [0], [1], [0, 0, 1, 1], [], []>} : vector<8x64xbf16>, vector<64x128xbf16>, vector<8x128xf32> -> vector<8x128xf32>
    %20 = arith.truncf %9 : vector<8x32xf32> to vector<8x32xbf16>
    %cst_16 = arith.constant dense<0.000000e+00> : vector<8x128xf32>
    %21 = tpu.matmul %20, %6, %cst_16 {dimension_numbers = #tpu.dot_dimension_numbers<[1], [0], [0], [1], [0, 0, 1, 1], [], []>} : vector<8x32xbf16>, vector<32x128xbf16>, vector<8x128xf32> -> vector<8x128xf32>
    %22 = arith.addf %19, %21 : vector<8x128xf32>
    %23 = vector.broadcast %8 : vector<1x128xf32> to vector<8x128xf32>
    %24 = arith.addf %22, %23 : vector<8x128xf32>
    %25 = vector.extract_strided_slice %24 {offsets = [0, 0], sizes = [8, 96], strides = [1, 1]} : vector<8x128xf32> to vector<8x96xf32>
    %26 = arith.negf %25 : vector<8x96xf32>
    %27 = math.exp %26 : vector<8x96xf32>
    %cst_17 = arith.constant 1.000000e+00 : f32
    %28 = vector.broadcast %cst_17 : f32 to vector<8x96xf32>
    %29 = arith.addf %28, %27 : vector<8x96xf32>
    %30 = arith.divf %28, %29 : vector<8x96xf32>
    %31 = vector.extract_strided_slice %24 {offsets = [0, 96], sizes = [8, 32], strides = [1, 1]} : vector<8x128xf32> to vector<8x32xf32>
    %32 = math.tanh %31 : vector<8x32xf32>
    %33 = vector.extract_strided_slice %30 {offsets = [0, 32], sizes = [8, 32], strides = [1, 1]} : vector<8x96xf32> to vector<8x32xf32>
    %34 = arith.mulf %33, %10 : vector<8x32xf32>
    %35 = vector.extract_strided_slice %30 {offsets = [0, 0], sizes = [8, 32], strides = [1, 1]} : vector<8x96xf32> to vector<8x32xf32>
    %36 = arith.mulf %35, %32 : vector<8x32xf32>
    %37 = arith.addf %34, %36 : vector<8x32xf32>
    %38 = vector.extract_strided_slice %30 {offsets = [0, 64], sizes = [8, 32], strides = [1, 1]} : vector<8x96xf32> to vector<8x32xf32>
    %39 = math.tanh %37 : vector<8x32xf32>
    %40 = arith.mulf %38, %39 : vector<8x32xf32>
    %c0_18 = arith.constant 0 : index
    %41 = arith.index_cast %14 : i32 to index
    %c0_19 = arith.constant 0 : index
    %c0_20 = arith.constant 0 : index
    %42 = vector.load %arg6[%c0_18, %41, %c0_19, %c0_20] : memref<1x8x8x32xf32, #tpu.memory_space<vmem>>, vector<1x1x8x32xf32>
    %43 = vector.shape_cast %42 : vector<1x1x8x32xf32> to vector<8x32xf32>
    %44 = vector.shape_cast %40 : vector<8x32xf32> to vector<1x1x8x32xf32>
    tpu.vector_store %arg6[%c0_18, %41, %c0_19, %c0_20], %44 {strides = array<i32>} : memref<1x8x8x32xf32, #tpu.memory_space<vmem>>, vector<1x1x8x32xf32>,
    %c1_i32 = arith.constant 1 : i32
    %c2_i32_21 = arith.constant 2 : i32
    %45 = arith.muli %c2_i32_21, %c1_i32 : i32
    %c7_i32_22 = arith.constant 7 : i32
    %46 = arith.subi %c7_i32_22, %45 : i32
    %47 = arith.muli %arg0, %46 : i32
    %48 = arith.addi %c1_i32, %47 : i32
    %49 = arith.index_cast %48 : i32 to index
    %c0_23 = arith.constant 0 : index
    %c0_24 = arith.constant 0 : index
    %50 = vector.load %arg2[%49, %c0_23, %c0_24] : memref<8x8x64xf32, #tpu.memory_space<vmem>>, vector<1x8x64xf32>
    %51 = vector.shape_cast %50 : vector<1x8x64xf32> to vector<8x64xf32>
    %52 = arith.truncf %51 : vector<8x64xf32> to vector<8x64xbf16>
    %cst_25 = arith.constant dense<0.000000e+00> : vector<8x128xf32>
    %53 = tpu.matmul %52, %4, %cst_25 {dimension_numbers = #tpu.dot_dimension_numbers<[1], [0], [0], [1], [0, 0, 1, 1], [], []>} : vector<8x64xbf16>, vector<64x128xbf16>, vector<8x128xf32> -> vector<8x128xf32>
    %54 = arith.truncf %40 : vector<8x32xf32> to vector<8x32xbf16>
    %cst_26 = arith.constant dense<0.000000e+00> : vector<8x128xf32>
    %55 = tpu.matmul %54, %6, %cst_26 {dimension_numbers = #tpu.dot_dimension_numbers<[1], [0], [0], [1], [0, 0, 1, 1], [], []>} : vector<8x32xbf16>, vector<32x128xbf16>, vector<8x128xf32> -> vector<8x128xf32>
    %56 = arith.addf %53, %55 : vector<8x128xf32>
    %57 = vector.broadcast %8 : vector<1x128xf32> to vector<8x128xf32>
    %58 = arith.addf %56, %57 : vector<8x128xf32>
    %59 = vector.extract_strided_slice %58 {offsets = [0, 0], sizes = [8, 96], strides = [1, 1]} : vector<8x128xf32> to vector<8x96xf32>
    %60 = arith.negf %59 : vector<8x96xf32>
    %61 = math.exp %60 : vector<8x96xf32>
    %cst_27 = arith.constant 1.000000e+00 : f32
    %62 = vector.broadcast %cst_27 : f32 to vector<8x96xf32>
    %63 = arith.addf %62, %61 : vector<8x96xf32>
    %64 = arith.divf %62, %63 : vector<8x96xf32>
    %65 = vector.extract_strided_slice %58 {offsets = [0, 96], sizes = [8, 32], strides = [1, 1]} : vector<8x128xf32> to vector<8x32xf32>
    %66 = math.tanh %65 : vector<8x32xf32>
    %67 = vector.extract_strided_slice %64 {offsets = [0, 32], sizes = [8, 32], strides = [1, 1]} : vector<8x96xf32> to vector<8x32xf32>
    %68 = arith.mulf %67, %37 : vector<8x32xf32>
    %69 = vector.extract_strided_slice %64 {offsets = [0, 0], sizes = [8, 32], strides = [1, 1]} : vector<8x96xf32> to vector<8x32xf32>
    %70 = arith.mulf %69, %66 : vector<8x32xf32>
    %71 = arith.addf %68, %70 : vector<8x32xf32>
    %72 = vector.extract_strided_slice %64 {offsets = [0, 64], sizes = [8, 32], strides = [1, 1]} : vector<8x96xf32> to vector<8x32xf32>
    %73 = math.tanh %71 : vector<8x32xf32>
    %74 = arith.mulf %72, %73 : vector<8x32xf32>
    %c0_28 = arith.constant 0 : index
    %75 = arith.index_cast %48 : i32 to index
    %c0_29 = arith.constant 0 : index
    %c0_30 = arith.constant 0 : index
    %76 = vector.load %arg6[%c0_28, %75, %c0_29, %c0_30] : memref<1x8x8x32xf32, #tpu.memory_space<vmem>>, vector<1x1x8x32xf32>
    %77 = vector.shape_cast %76 : vector<1x1x8x32xf32> to vector<8x32xf32>
    %78 = vector.shape_cast %74 : vector<8x32xf32> to vector<1x1x8x32xf32>
    tpu.vector_store %arg6[%c0_28, %75, %c0_29, %c0_30], %78 {strides = array<i32>} : memref<1x8x8x32xf32, #tpu.memory_space<vmem>>, vector<1x1x8x32xf32>,
    %c2_i32_31 = arith.constant 2 : i32
    %c2_i32_32 = arith.constant 2 : i32
    %79 = arith.muli %c2_i32_32, %c2_i32_31 : i32
    %c7_i32_33 = arith.constant 7 : i32
    %80 = arith.subi %c7_i32_33, %79 : i32
    %81 = arith.muli %arg0, %80 : i32
    %82 = arith.addi %c2_i32_31, %81 : i32
    %83 = arith.index_cast %82 : i32 to index
    %c0_34 = arith.constant 0 : index
    %c0_35 = arith.constant 0 : index
    %84 = vector.load %arg2[%83, %c0_34, %c0_35] : memref<8x8x64xf32, #tpu.memory_space<vmem>>, vector<1x8x64xf32>
    %85 = vector.shape_cast %84 : vector<1x8x64xf32> to vector<8x64xf32>
    %86 = arith.truncf %85 : vector<8x64xf32> to vector<8x64xbf16>
    %cst_36 = arith.constant dense<0.000000e+00> : vector<8x128xf32>
    %87 = tpu.matmul %86, %4, %cst_36 {dimension_numbers = #tpu.dot_dimension_numbers<[1], [0], [0], [1], [0, 0, 1, 1], [], []>} : vector<8x64xbf16>, vector<64x128xbf16>, vector<8x128xf32> -> vector<8x128xf32>
    %88 = arith.truncf %74 : vector<8x32xf32> to vector<8x32xbf16>
    %cst_37 = arith.constant dense<0.000000e+00> : vector<8x128xf32>
    %89 = tpu.matmul %88, %6, %cst_37 {dimension_numbers = #tpu.dot_dimension_numbers<[1], [0], [0], [1], [0, 0, 1, 1], [], []>} : vector<8x32xbf16>, vector<32x128xbf16>, vector<8x128xf32> -> vector<8x128xf32>
    %90 = arith.addf %87, %89 : vector<8x128xf32>
    %91 = vector.broadcast %8 : vector<1x128xf32> to vector<8x128xf32>
    %92 = arith.addf %90, %91 : vector<8x128xf32>
    %93 = vector.extract_strided_slice %92 {offsets = [0, 0], sizes = [8, 96], strides = [1, 1]} : vector<8x128xf32> to vector<8x96xf32>
    %94 = arith.negf %93 : vector<8x96xf32>
    %95 = math.exp %94 : vector<8x96xf32>
    %cst_38 = arith.constant 1.000000e+00 : f32
    %96 = vector.broadcast %cst_38 : f32 to vector<8x96xf32>
    %97 = arith.addf %96, %95 : vector<8x96xf32>
    %98 = arith.divf %96, %97 : vector<8x96xf32>
    %99 = vector.extract_strided_slice %92 {offsets = [0, 96], sizes = [8, 32], strides = [1, 1]} : vector<8x128xf32> to vector<8x32xf32>
    %100 = math.tanh %99 : vector<8x32xf32>
    %101 = vector.extract_strided_slice %98 {offsets = [0, 32], sizes = [8, 32], strides = [1, 1]} : vector<8x96xf32> to vector<8x32xf32>
    %102 = arith.mulf %101, %71 : vector<8x32xf32>
    %103 = vector.extract_strided_slice %98 {offsets = [0, 0], sizes = [8, 32], strides = [1, 1]} : vector<8x96xf32> to vector<8x32xf32>
    %104 = arith.mulf %103, %100 : vector<8x32xf32>
    %105 = arith.addf %102, %104 : vector<8x32xf32>
    %106 = vector.extract_strided_slice %98 {offsets = [0, 64], sizes = [8, 32], strides = [1, 1]} : vector<8x96xf32> to vector<8x32xf32>
    %107 = math.tanh %105 : vector<8x32xf32>
    %108 = arith.mulf %106, %107 : vector<8x32xf32>
    %c0_39 = arith.constant 0 : index
    %109 = arith.index_cast %82 : i32 to index
    %c0_40 = arith.constant 0 : index
    %c0_41 = arith.constant 0 : index
    %110 = vector.load %arg6[%c0_39, %109, %c0_40, %c0_41] : memref<1x8x8x32xf32, #tpu.memory_space<vmem>>, vector<1x1x8x32xf32>
    %111 = vector.shape_cast %110 : vector<1x1x8x32xf32> to vector<8x32xf32>
    %112 = vector.shape_cast %108 : vector<8x32xf32> to vector<1x1x8x32xf32>
    tpu.vector_store %arg6[%c0_39, %109, %c0_40, %c0_41], %112 {strides = array<i32>} : memref<1x8x8x32xf32, #tpu.memory_space<vmem>>, vector<1x1x8x32xf32>,
    %c3_i32 = arith.constant 3 : i32
    %c2_i32_42 = arith.constant 2 : i32
    %113 = arith.muli %c2_i32_42, %c3_i32 : i32
    %c7_i32_43 = arith.constant 7 : i32
    %114 = arith.subi %c7_i32_43, %113 : i32
    %115 = arith.muli %arg0, %114 : i32
    %116 = arith.addi %c3_i32, %115 : i32
    %117 = arith.index_cast %116 : i32 to index
    %c0_44 = arith.constant 0 : index
    %c0_45 = arith.constant 0 : index
    %118 = vector.load %arg2[%117, %c0_44, %c0_45] : memref<8x8x64xf32, #tpu.memory_space<vmem>>, vector<1x8x64xf32>
    %119 = vector.shape_cast %118 : vector<1x8x64xf32> to vector<8x64xf32>
    %120 = arith.truncf %119 : vector<8x64xf32> to vector<8x64xbf16>
    %cst_46 = arith.constant dense<0.000000e+00> : vector<8x128xf32>
    %121 = tpu.matmul %120, %4, %cst_46 {dimension_numbers = #tpu.dot_dimension_numbers<[1], [0], [0], [1], [0, 0, 1, 1], [], []>} : vector<8x64xbf16>, vector<64x128xbf16>, vector<8x128xf32> -> vector<8x128xf32>
    %122 = arith.truncf %108 : vector<8x32xf32> to vector<8x32xbf16>
    %cst_47 = arith.constant dense<0.000000e+00> : vector<8x128xf32>
    %123 = tpu.matmul %122, %6, %cst_47 {dimension_numbers = #tpu.dot_dimension_numbers<[1], [0], [0], [1], [0, 0, 1, 1], [], []>} : vector<8x32xbf16>, vector<32x128xbf16>, vector<8x128xf32> -> vector<8x128xf32>
    %124 = arith.addf %121, %123 : vector<8x128xf32>
    %125 = vector.broadcast %8 : vector<1x128xf32> to vector<8x128xf32>
    %126 = arith.addf %124, %125 : vector<8x128xf32>
    %127 = vector.extract_strided_slice %126 {offsets = [0, 0], sizes = [8, 96], strides = [1, 1]} : vector<8x128xf32> to vector<8x96xf32>
    %128 = arith.negf %127 : vector<8x96xf32>
    %129 = math.exp %128 : vector<8x96xf32>
    %cst_48 = arith.constant 1.000000e+00 : f32
    %130 = vector.broadcast %cst_48 : f32 to vector<8x96xf32>
    %131 = arith.addf %130, %129 : vector<8x96xf32>
    %132 = arith.divf %130, %131 : vector<8x96xf32>
    %133 = vector.extract_strided_slice %126 {offsets = [0, 96], sizes = [8, 32], strides = [1, 1]} : vector<8x128xf32> to vector<8x32xf32>
    %134 = math.tanh %133 : vector<8x32xf32>
    %135 = vector.extract_strided_slice %132 {offsets = [0, 32], sizes = [8, 32], strides = [1, 1]} : vector<8x96xf32> to vector<8x32xf32>
    %136 = arith.mulf %135, %105 : vector<8x32xf32>
    %137 = vector.extract_strided_slice %132 {offsets = [0, 0], sizes = [8, 32], strides = [1, 1]} : vector<8x96xf32> to vector<8x32xf32>
    %138 = arith.mulf %137, %134 : vector<8x32xf32>
    %139 = arith.addf %136, %138 : vector<8x32xf32>
    %140 = vector.extract_strided_slice %132 {offsets = [0, 64], sizes = [8, 32], strides = [1, 1]} : vector<8x96xf32> to vector<8x32xf32>
    %141 = math.tanh %139 : vector<8x32xf32>
    %142 = arith.mulf %140, %141 : vector<8x32xf32>
    %c0_49 = arith.constant 0 : index
    %143 = arith.index_cast %116 : i32 to index
    %c0_50 = arith.constant 0 : index
    %c0_51 = arith.constant 0 : index
    %144 = vector.load %arg6[%c0_49, %143, %c0_50, %c0_51] : memref<1x8x8x32xf32, #tpu.memory_space<vmem>>, vector<1x1x8x32xf32>
    %145 = vector.shape_cast %144 : vector<1x1x8x32xf32> to vector<8x32xf32>
    %146 = vector.shape_cast %142 : vector<8x32xf32> to vector<1x1x8x32xf32>
    tpu.vector_store %arg6[%c0_49, %143, %c0_50, %c0_51], %146 {strides = array<i32>} : memref<1x8x8x32xf32, #tpu.memory_space<vmem>>, vector<1x1x8x32xf32>,
    %c4_i32 = arith.constant 4 : i32
    %c2_i32_52 = arith.constant 2 : i32
    %147 = arith.muli %c2_i32_52, %c4_i32 : i32
    %c7_i32_53 = arith.constant 7 : i32
    %148 = arith.subi %c7_i32_53, %147 : i32
    %149 = arith.muli %arg0, %148 : i32
    %150 = arith.addi %c4_i32, %149 : i32
    %151 = arith.index_cast %150 : i32 to index
    %c0_54 = arith.constant 0 : index
    %c0_55 = arith.constant 0 : index
    %152 = vector.load %arg2[%151, %c0_54, %c0_55] : memref<8x8x64xf32, #tpu.memory_space<vmem>>, vector<1x8x64xf32>
    %153 = vector.shape_cast %152 : vector<1x8x64xf32> to vector<8x64xf32>
    %154 = arith.truncf %153 : vector<8x64xf32> to vector<8x64xbf16>
    %cst_56 = arith.constant dense<0.000000e+00> : vector<8x128xf32>
    %155 = tpu.matmul %154, %4, %cst_56 {dimension_numbers = #tpu.dot_dimension_numbers<[1], [0], [0], [1], [0, 0, 1, 1], [], []>} : vector<8x64xbf16>, vector<64x128xbf16>, vector<8x128xf32> -> vector<8x128xf32>
    %156 = arith.truncf %142 : vector<8x32xf32> to vector<8x32xbf16>
    %cst_57 = arith.constant dense<0.000000e+00> : vector<8x128xf32>
    %157 = tpu.matmul %156, %6, %cst_57 {dimension_numbers = #tpu.dot_dimension_numbers<[1], [0], [0], [1], [0, 0, 1, 1], [], []>} : vector<8x32xbf16>, vector<32x128xbf16>, vector<8x128xf32> -> vector<8x128xf32>
    %158 = arith.addf %155, %157 : vector<8x128xf32>
    %159 = vector.broadcast %8 : vector<1x128xf32> to vector<8x128xf32>
    %160 = arith.addf %158, %159 : vector<8x128xf32>
    %161 = vector.extract_strided_slice %160 {offsets = [0, 0], sizes = [8, 96], strides = [1, 1]} : vector<8x128xf32> to vector<8x96xf32>
    %162 = arith.negf %161 : vector<8x96xf32>
    %163 = math.exp %162 : vector<8x96xf32>
    %cst_58 = arith.constant 1.000000e+00 : f32
    %164 = vector.broadcast %cst_58 : f32 to vector<8x96xf32>
    %165 = arith.addf %164, %163 : vector<8x96xf32>
    %166 = arith.divf %164, %165 : vector<8x96xf32>
    %167 = vector.extract_strided_slice %160 {offsets = [0, 96], sizes = [8, 32], strides = [1, 1]} : vector<8x128xf32> to vector<8x32xf32>
    %168 = math.tanh %167 : vector<8x32xf32>
    %169 = vector.extract_strided_slice %166 {offsets = [0, 32], sizes = [8, 32], strides = [1, 1]} : vector<8x96xf32> to vector<8x32xf32>
    %170 = arith.mulf %169, %139 : vector<8x32xf32>
    %171 = vector.extract_strided_slice %166 {offsets = [0, 0], sizes = [8, 32], strides = [1, 1]} : vector<8x96xf32> to vector<8x32xf32>
    %172 = arith.mulf %171, %168 : vector<8x32xf32>
    %173 = arith.addf %170, %172 : vector<8x32xf32>
    %174 = vector.extract_strided_slice %166 {offsets = [0, 64], sizes = [8, 32], strides = [1, 1]} : vector<8x96xf32> to vector<8x32xf32>
    %175 = math.tanh %173 : vector<8x32xf32>
    %176 = arith.mulf %174, %175 : vector<8x32xf32>
    %c0_59 = arith.constant 0 : index
    %177 = arith.index_cast %150 : i32 to index
    %c0_60 = arith.constant 0 : index
    %c0_61 = arith.constant 0 : index
    %178 = vector.load %arg6[%c0_59, %177, %c0_60, %c0_61] : memref<1x8x8x32xf32, #tpu.memory_space<vmem>>, vector<1x1x8x32xf32>
    %179 = vector.shape_cast %178 : vector<1x1x8x32xf32> to vector<8x32xf32>
    %180 = vector.shape_cast %176 : vector<8x32xf32> to vector<1x1x8x32xf32>
    tpu.vector_store %arg6[%c0_59, %177, %c0_60, %c0_61], %180 {strides = array<i32>} : memref<1x8x8x32xf32, #tpu.memory_space<vmem>>, vector<1x1x8x32xf32>,
    %c5_i32 = arith.constant 5 : i32
    %c2_i32_62 = arith.constant 2 : i32
    %181 = arith.muli %c2_i32_62, %c5_i32 : i32
    %c7_i32_63 = arith.constant 7 : i32
    %182 = arith.subi %c7_i32_63, %181 : i32
    %183 = arith.muli %arg0, %182 : i32
    %184 = arith.addi %c5_i32, %183 : i32
    %185 = arith.index_cast %184 : i32 to index
    %c0_64 = arith.constant 0 : index
    %c0_65 = arith.constant 0 : index
    %186 = vector.load %arg2[%185, %c0_64, %c0_65] : memref<8x8x64xf32, #tpu.memory_space<vmem>>, vector<1x8x64xf32>
    %187 = vector.shape_cast %186 : vector<1x8x64xf32> to vector<8x64xf32>
    %188 = arith.truncf %187 : vector<8x64xf32> to vector<8x64xbf16>
    %cst_66 = arith.constant dense<0.000000e+00> : vector<8x128xf32>
    %189 = tpu.matmul %188, %4, %cst_66 {dimension_numbers = #tpu.dot_dimension_numbers<[1], [0], [0], [1], [0, 0, 1, 1], [], []>} : vector<8x64xbf16>, vector<64x128xbf16>, vector<8x128xf32> -> vector<8x128xf32>
    %190 = arith.truncf %176 : vector<8x32xf32> to vector<8x32xbf16>
    %cst_67 = arith.constant dense<0.000000e+00> : vector<8x128xf32>
    %191 = tpu.matmul %190, %6, %cst_67 {dimension_numbers = #tpu.dot_dimension_numbers<[1], [0], [0], [1], [0, 0, 1, 1], [], []>} : vector<8x32xbf16>, vector<32x128xbf16>, vector<8x128xf32> -> vector<8x128xf32>
    %192 = arith.addf %189, %191 : vector<8x128xf32>
    %193 = vector.broadcast %8 : vector<1x128xf32> to vector<8x128xf32>
    %194 = arith.addf %192, %193 : vector<8x128xf32>
    %195 = vector.extract_strided_slice %194 {offsets = [0, 0], sizes = [8, 96], strides = [1, 1]} : vector<8x128xf32> to vector<8x96xf32>
    %196 = arith.negf %195 : vector<8x96xf32>
    %197 = math.exp %196 : vector<8x96xf32>
    %cst_68 = arith.constant 1.000000e+00 : f32
    %198 = vector.broadcast %cst_68 : f32 to vector<8x96xf32>
    %199 = arith.addf %198, %197 : vector<8x96xf32>
    %200 = arith.divf %198, %199 : vector<8x96xf32>
    %201 = vector.extract_strided_slice %194 {offsets = [0, 96], sizes = [8, 32], strides = [1, 1]} : vector<8x128xf32> to vector<8x32xf32>
    %202 = math.tanh %201 : vector<8x32xf32>
    %203 = vector.extract_strided_slice %200 {offsets = [0, 32], sizes = [8, 32], strides = [1, 1]} : vector<8x96xf32> to vector<8x32xf32>
    %204 = arith.mulf %203, %173 : vector<8x32xf32>
    %205 = vector.extract_strided_slice %200 {offsets = [0, 0], sizes = [8, 32], strides = [1, 1]} : vector<8x96xf32> to vector<8x32xf32>
    %206 = arith.mulf %205, %202 : vector<8x32xf32>
    %207 = arith.addf %204, %206 : vector<8x32xf32>
    %208 = vector.extract_strided_slice %200 {offsets = [0, 64], sizes = [8, 32], strides = [1, 1]} : vector<8x96xf32> to vector<8x32xf32>
    %209 = math.tanh %207 : vector<8x32xf32>
    %210 = arith.mulf %208, %209 : vector<8x32xf32>
    %c0_69 = arith.constant 0 : index
    %211 = arith.index_cast %184 : i32 to index
    %c0_70 = arith.constant 0 : index
    %c0_71 = arith.constant 0 : index
    %212 = vector.load %arg6[%c0_69, %211, %c0_70, %c0_71] : memref<1x8x8x32xf32, #tpu.memory_space<vmem>>, vector<1x1x8x32xf32>
    %213 = vector.shape_cast %212 : vector<1x1x8x32xf32> to vector<8x32xf32>
    %214 = vector.shape_cast %210 : vector<8x32xf32> to vector<1x1x8x32xf32>
    tpu.vector_store %arg6[%c0_69, %211, %c0_70, %c0_71], %214 {strides = array<i32>} : memref<1x8x8x32xf32, #tpu.memory_space<vmem>>, vector<1x1x8x32xf32>,
    %c6_i32 = arith.constant 6 : i32
    %c2_i32_72 = arith.constant 2 : i32
    %215 = arith.muli %c2_i32_72, %c6_i32 : i32
    %c7_i32_73 = arith.constant 7 : i32
    %216 = arith.subi %c7_i32_73, %215 : i32
    %217 = arith.muli %arg0, %216 : i32
    %218 = arith.addi %c6_i32, %217 : i32
    %219 = arith.index_cast %218 : i32 to index
    %c0_74 = arith.constant 0 : index
    %c0_75 = arith.constant 0 : index
    %220 = vector.load %arg2[%219, %c0_74, %c0_75] : memref<8x8x64xf32, #tpu.memory_space<vmem>>, vector<1x8x64xf32>
    %221 = vector.shape_cast %220 : vector<1x8x64xf32> to vector<8x64xf32>
    %222 = arith.truncf %221 : vector<8x64xf32> to vector<8x64xbf16>
    %cst_76 = arith.constant dense<0.000000e+00> : vector<8x128xf32>
    %223 = tpu.matmul %222, %4, %cst_76 {dimension_numbers = #tpu.dot_dimension_numbers<[1], [0], [0], [1], [0, 0, 1, 1], [], []>} : vector<8x64xbf16>, vector<64x128xbf16>, vector<8x128xf32> -> vector<8x128xf32>
    %224 = arith.truncf %210 : vector<8x32xf32> to vector<8x32xbf16>
    %cst_77 = arith.constant dense<0.000000e+00> : vector<8x128xf32>
    %225 = tpu.matmul %224, %6, %cst_77 {dimension_numbers = #tpu.dot_dimension_numbers<[1], [0], [0], [1], [0, 0, 1, 1], [], []>} : vector<8x32xbf16>, vector<32x128xbf16>, vector<8x128xf32> -> vector<8x128xf32>
    %226 = arith.addf %223, %225 : vector<8x128xf32>
    %227 = vector.broadcast %8 : vector<1x128xf32> to vector<8x128xf32>
    %228 = arith.addf %226, %227 : vector<8x128xf32>
    %229 = vector.extract_strided_slice %228 {offsets = [0, 0], sizes = [8, 96], strides = [1, 1]} : vector<8x128xf32> to vector<8x96xf32>
    %230 = arith.negf %229 : vector<8x96xf32>
    %231 = math.exp %230 : vector<8x96xf32>
    %cst_78 = arith.constant 1.000000e+00 : f32
    %232 = vector.broadcast %cst_78 : f32 to vector<8x96xf32>
    %233 = arith.addf %232, %231 : vector<8x96xf32>
    %234 = arith.divf %232, %233 : vector<8x96xf32>
    %235 = vector.extract_strided_slice %228 {offsets = [0, 96], sizes = [8, 32], strides = [1, 1]} : vector<8x128xf32> to vector<8x32xf32>
    %236 = math.tanh %235 : vector<8x32xf32>
    %237 = vector.extract_strided_slice %234 {offsets = [0, 32], sizes = [8, 32], strides = [1, 1]} : vector<8x96xf32> to vector<8x32xf32>
    %238 = arith.mulf %237, %207 : vector<8x32xf32>
    %239 = vector.extract_strided_slice %234 {offsets = [0, 0], sizes = [8, 32], strides = [1, 1]} : vector<8x96xf32> to vector<8x32xf32>
    %240 = arith.mulf %239, %236 : vector<8x32xf32>
    %241 = arith.addf %238, %240 : vector<8x32xf32>
    %242 = vector.extract_strided_slice %234 {offsets = [0, 64], sizes = [8, 32], strides = [1, 1]} : vector<8x96xf32> to vector<8x32xf32>
    %243 = math.tanh %241 : vector<8x32xf32>
    %244 = arith.mulf %242, %243 : vector<8x32xf32>
    %c0_79 = arith.constant 0 : index
    %245 = arith.index_cast %218 : i32 to index
    %c0_80 = arith.constant 0 : index
    %c0_81 = arith.constant 0 : index
    %246 = vector.load %arg6[%c0_79, %245, %c0_80, %c0_81] : memref<1x8x8x32xf32, #tpu.memory_space<vmem>>, vector<1x1x8x32xf32>
    %247 = vector.shape_cast %246 : vector<1x1x8x32xf32> to vector<8x32xf32>
    %248 = vector.shape_cast %244 : vector<8x32xf32> to vector<1x1x8x32xf32>
    tpu.vector_store %arg6[%c0_79, %245, %c0_80, %c0_81], %248 {strides = array<i32>} : memref<1x8x8x32xf32, #tpu.memory_space<vmem>>, vector<1x1x8x32xf32>,
    %c7_i32_82 = arith.constant 7 : i32
    %c2_i32_83 = arith.constant 2 : i32
    %249 = arith.muli %c2_i32_83, %c7_i32_82 : i32
    %c7_i32_84 = arith.constant 7 : i32
    %250 = arith.subi %c7_i32_84, %249 : i32
    %251 = arith.muli %arg0, %250 : i32
    %252 = arith.addi %c7_i32_82, %251 : i32
    %253 = arith.index_cast %252 : i32 to index
    %c0_85 = arith.constant 0 : index
    %c0_86 = arith.constant 0 : index
    %254 = vector.load %arg2[%253, %c0_85, %c0_86] : memref<8x8x64xf32, #tpu.memory_space<vmem>>, vector<1x8x64xf32>
    %255 = vector.shape_cast %254 : vector<1x8x64xf32> to vector<8x64xf32>
    %256 = arith.truncf %255 : vector<8x64xf32> to vector<8x64xbf16>
    %cst_87 = arith.constant dense<0.000000e+00> : vector<8x128xf32>
    %257 = tpu.matmul %256, %4, %cst_87 {dimension_numbers = #tpu.dot_dimension_numbers<[1], [0], [0], [1], [0, 0, 1, 1], [], []>} : vector<8x64xbf16>, vector<64x128xbf16>, vector<8x128xf32> -> vector<8x128xf32>
    %258 = arith.truncf %244 : vector<8x32xf32> to vector<8x32xbf16>
    %cst_88 = arith.constant dense<0.000000e+00> : vector<8x128xf32>
    %259 = tpu.matmul %258, %6, %cst_88 {dimension_numbers = #tpu.dot_dimension_numbers<[1], [0], [0], [1], [0, 0, 1, 1], [], []>} : vector<8x32xbf16>, vector<32x128xbf16>, vector<8x128xf32> -> vector<8x128xf32>
    %260 = arith.addf %257, %259 : vector<8x128xf32>
    %261 = vector.broadcast %8 : vector<1x128xf32> to vector<8x128xf32>
    %262 = arith.addf %260, %261 : vector<8x128xf32>
    %263 = vector.extract_strided_slice %262 {offsets = [0, 0], sizes = [8, 96], strides = [1, 1]} : vector<8x128xf32> to vector<8x96xf32>
    %264 = arith.negf %263 : vector<8x96xf32>
    %265 = math.exp %264 : vector<8x96xf32>
    %cst_89 = arith.constant 1.000000e+00 : f32
    %266 = vector.broadcast %cst_89 : f32 to vector<8x96xf32>
    %267 = arith.addf %266, %265 : vector<8x96xf32>
    %268 = arith.divf %266, %267 : vector<8x96xf32>
    %269 = vector.extract_strided_slice %262 {offsets = [0, 96], sizes = [8, 32], strides = [1, 1]} : vector<8x128xf32> to vector<8x32xf32>
    %270 = math.tanh %269 : vector<8x32xf32>
    %271 = vector.extract_strided_slice %268 {offsets = [0, 32], sizes = [8, 32], strides = [1, 1]} : vector<8x96xf32> to vector<8x32xf32>
    %272 = arith.mulf %271, %241 : vector<8x32xf32>
    %273 = vector.extract_strided_slice %268 {offsets = [0, 0], sizes = [8, 32], strides = [1, 1]} : vector<8x96xf32> to vector<8x32xf32>
    %274 = arith.mulf %273, %270 : vector<8x32xf32>
    %275 = arith.addf %272, %274 : vector<8x32xf32>
    %276 = vector.extract_strided_slice %268 {offsets = [0, 64], sizes = [8, 32], strides = [1, 1]} : vector<8x96xf32> to vector<8x32xf32>
    %277 = math.tanh %275 : vector<8x32xf32>
    %278 = arith.mulf %276, %277 : vector<8x32xf32>
    %c0_90 = arith.constant 0 : index
    %279 = arith.index_cast %252 : i32 to index
    %c0_91 = arith.constant 0 : index
    %c0_92 = arith.constant 0 : index
    %280 = vector.load %arg6[%c0_90, %279, %c0_91, %c0_92] : memref<1x8x8x32xf32, #tpu.memory_space<vmem>>, vector<1x1x8x32xf32>
    %281 = vector.shape_cast %280 : vector<1x1x8x32xf32> to vector<8x32xf32>
    %282 = vector.shape_cast %278 : vector<8x32xf32> to vector<1x1x8x32xf32>
    tpu.vector_store %arg6[%c0_90, %279, %c0_91, %c0_92], %282 {strides = array<i32>} : memref<1x8x8x32xf32, #tpu.memory_space<vmem>>, vector<1x1x8x32xf32>,
    %c8_i32 = arith.constant 8 : i32
    %c0_93 = arith.constant 0 : index
    %c0_94 = arith.constant 0 : index
    %283 = vector.load %arg7[%c0_93, %c0_94] : memref<8x32xf32, #tpu.memory_space<vmem>>, vector<8x32xf32>
    tpu.vector_store %arg7[%c0_93, %c0_94], %278 {strides = array<i32>} : memref<8x32xf32, #tpu.memory_space<vmem>>, vector<8x32xf32>,
    %c0_95 = arith.constant 0 : index
    %c0_96 = arith.constant 0 : index
    %284 = vector.load %arg8[%c0_95, %c0_96] : memref<8x32xf32, #tpu.memory_space<vmem>>, vector<8x32xf32>
    tpu.vector_store %arg8[%c0_95, %c0_96], %275 {strides = array<i32>} : memref<8x32xf32, #tpu.memory_space<vmem>>, vector<8x32xf32>,
    return
  }
  func.func @transform_0(%arg0: i32, %arg1: i32) -> (i32, i32, i32) {
    %c2_i32 = arith.constant 2 : i32
    %0 = arith.muli %c2_i32, %arg1 : i32
    %c0_i32 = arith.constant 0 : i32
    %1 = arith.subi %c0_i32, %0 : i32
    %2 = arith.muli %arg0, %1 : i32
    %3 = arith.addi %arg1, %2 : i32
    %c0_i32_0 = arith.constant 0 : i32
    %c0_i32_1 = arith.constant 0 : i32
    %c0_i32_2 = arith.constant 0 : i32
    return %3, %c0_i32_0, %c0_i32_1 : i32, i32, i32
  }
  func.func @transform_1(%arg0: i32, %arg1: i32) -> (i32, i32, i32) {
    %c0_i32 = arith.constant 0 : i32
    %c0_i32_0 = arith.constant 0 : i32
    %c0_i32_1 = arith.constant 0 : i32
    return %arg0, %c0_i32, %c0_i32_0 : i32, i32, i32
  }
  func.func @transform_2(%arg0: i32, %arg1: i32) -> (i32, i32, i32) {
    %c0_i32 = arith.constant 0 : i32
    %c0_i32_0 = arith.constant 0 : i32
    %c0_i32_1 = arith.constant 0 : i32
    return %arg0, %c0_i32, %c0_i32_0 : i32, i32, i32
  }
  func.func @transform_3(%arg0: i32, %arg1: i32) -> (i32, i32, i32) {
    %c0_i32 = arith.constant 0 : i32
    %c0_i32_0 = arith.constant 0 : i32
    %c0_i32_1 = arith.constant 0 : i32
    return %arg0, %c0_i32, %c0_i32_0 : i32, i32, i32
  }
  func.func @transform_4(%arg0: i32, %arg1: i32) -> (i32, i32, i32, i32) {
    %c2_i32 = arith.constant 2 : i32
    %0 = arith.muli %c2_i32, %arg1 : i32
    %c0_i32 = arith.constant 0 : i32
    %1 = arith.subi %c0_i32, %0 : i32
    %2 = arith.muli %arg0, %1 : i32
    %3 = arith.addi %arg1, %2 : i32
    %c0_i32_0 = arith.constant 0 : i32
    %c0_i32_1 = arith.constant 0 : i32
    %c0_i32_2 = arith.constant 0 : i32
    return %arg0, %3, %c0_i32_0, %c0_i32_1 : i32, i32, i32, i32
  }
}

</mosaic_0001>

<bundles_post_ra>
// kernel: bidirectional_lstm.2
= control target key start
LH: loop header
LB: loop body
LE: loop exit
PB: predicated region body
PF: predicated region fallthrough
CT: control target
= control target key end

     0   :  { %s1941_s15 = smov 0   ;;  %s1943_s16 = smov 0   ;;  %s2260_s0 = inlined_call_operand.vmem [shape: f32[8,8,16], index: 0, kind: input, shape index: {}]   ;;  %s2261_s1 = inlined_call_operand.vmem [shape: bf16[2,16,128], index: 1, kind: input, shape index: {}]   ;;  %s2262_s2 = inlined_call_operand.vmem [shape: bf16[2,32,128], index: 2, kind: input, shape index: {}]   ;;  %s2263_s3 = inlined_call_operand.vmem [shape: f32[2,1,128], index: 3, kind: input, shape index: {}]   ;;  %s2264_s4 = inlined_call_operand.vmem [shape: f32[2,8,8,32], index: 4, kind: output, shape index: {}]  }
   0x1   :  { %s1945_s17 = smov 0  }
   0x2 LB: > { %s26_s18 = sadd.s32 1, %s1905_s16  ;;  %p1573_p0 = scmp.ge.s32.totalorder %s1909_s17, 1  ;;  %s1909_s17 = sphi %s1945_s17, %s14_s17   ;;  %s1905_s16 = sphi %s1943_s16, %s2266_s16   ;;  %s1901_s15 = sphi %s1941_s15, %s2265_s15  }
   0x3   : > { %p28_p1 = scmp.ge.s32.totalorder %s26_s18, 2  ;;  %p229_p2 = scmp.lt.s32.totalorder %s1909_s17, 3 }
   0x5   : > { %s2268_s18 = smov (%p28_p1, %s26_s18), 0  ;;  %p230_p3 = pnand %p1573_p0, %p229_p2 }
   0x6   : > { %p294_p4 = scmp.lt.s32.totalorder (!%p230_p3), %s1901_s15, 1  ;;  %s1580_s19 = smul.u32 (!%p230_p3), 56, %s1901_s15  ;;  %vm330_vm0 = vcmask (!%p230_p3), 261120   ;;  %v1911_v0 = vmov (!%p230_p3), 0.0   ;;  %vm1912_vm1 = vmmov (!%p230_p3), 0   ;;  %vm410_vm2 = vcmask (!%p230_p3), 130048  }
   0x7   : > { %233 = sbr.rel (%p230_p3) target bundleno = 5673 (0x1629), region = 36  ;;  %1679 = vmatprep.subr.bf16.mxu0 (!%p230_p3), %v1911_v0  ;;  %1687 = vmatprep.subr.bf16.mxu1 (!%p230_p3), %v1911_v0  ;;  %331 = vst.msk [vmem:[#allocation2] sm:$0xff] (!%p230_p3), %vm330_vm0, %v1911_v0  ;;  %332 = vst.msk [vmem:[#allocation3] sm:$0xff] (!%p230_p3), %vm330_vm0, %v1911_v0  ;;  %s1913_s9 = smov (!%p230_p3), 32  }
   0x8   : > { %1689 = vmatprep.mubr.msk.bf16.mxu1 (!%p230_p3), %vm1912_vm1, %v1911_v0  ;;  %1683 = vmatprep.mubr.msk.bf16.mxu0 (!%p230_p3), %vm1912_vm1, %v1911_v0  ;;  %s344_s23 = scalar_lea.vmem (!%p230_p3), %s2260_s0, %s1580_s19  ;;  %s1588_s10 = smul.u32 (!%p230_p3), 40, %s1901_s15 }
   0x9   : > { %v345_v1 = vld [vmem:[%s344_s23] sm:$0xff] (!%p230_p3)  ;;  %s1914_s14 = smov (!%p230_p3), 64   ;;  %s1595_s21 = smul.u32 (!%p230_p3), 24, %s1901_s15 }
   0xa   : > { %v346_v5 = vpack.c.bf16 (!%p230_p3), %v345_v1, %v345_v1  ;;  %s1465_s13 = scalar_lea.vmem (!%p230_p3), %s2260_s0, %s1588_s10  ;;  %s875_s29 = ssub.s32 (!%p230_p3), 4, %s1901_s15 }
   0xb   : > { %v1589_v31 = vld [vmem:[%s1465_s13 + $0x8] sm:$0xff] (!%p230_p3)  ;;  %s2105_s30 = sshll.u32 (!%p230_p3), %s875_s29, 3  ;;  %s1620_s22 = smul.u32 (!%p230_p3), 4294967256, %s1901_s15 }
   0xc   : > { %v500_v32 = vpack.c.bf16 (!%p230_p3), %v1589_v31, %v1589_v31  ;;  %s877_s7 = scalar_lea.vmem (!%p230_p3), %s2260_s0, %s2105_s30  ;;  %s1627_s27 = smul.u32 (!%p230_p3), 4294967240, %s1901_s15 }
   0xd   : > { %s1499_s26 = scalar_lea.vmem (!%p230_p3), %s2260_s0, %s1620_s22  ;;  %s1915_s23 = smov (!%p230_p3), 96  }
   0xe   : > { %s1970_s20 = scalar_select %p294_p4, %s1901_s15, 1  ;;  %v340_v6 = vld [vmem:[#allocation2] sm:$0xff]  ;;  %v341_v20 = vld [vmem:[#allocation3] sm:$0xff] }
   0xf   : > { %v347_v7 = vpack.c.bf16 %v340_v6, %v340_v6 }
  0x10   : > { %s1637_s24 = sshll.u32 %s1970_s20, 4  ;;  %s1636_s25 = sshll.u32 %s1970_s20, 3 }
  0x11   : > { %s303_s28 = scalar_lea.vmem %s2262_s2, %s1637_s24  ;;  %s298_s5 = scalar_lea.vmem %s2261_s1, %s1636_s25 }
  0x12   : > { %v1989_v2 = vld [vmem:[%s303_s28] sm:$0xff]   ;;  %v1994_v4 = vld [vmem:[%s303_s28 + $0x8] sm:$0xff]   ;;  %s306_s8 = scalar_lea.vmem %s2263_s3, %s1970_s20  ;;  %s1473_s24 = scalar_lea.vmem %s2260_s0, %s1595_s21 }
  0x13   : > { %v1991_v3 = vld [vmem:[%s298_s5] sm:$0xff]   ;;  %1680 = vmatpush3.bf16.msra.mxu0 %v1989_v2  ;;  %v1596_v58 = vld [vmem:[%s1473_s24 + $0x10] sm:$0xff]  ;;  %s1602_s25 = sshll.u32 %s1901_s15, 3  ;;  %s1507_s5 = scalar_lea.vmem %s2260_s0, %s1627_s27 }
  0x14   : > { %1688 = vmatpush3.bf16.msra.mxu1 %v1991_v3  ;;  %1681 = vmatprep.subr.bf16.mxu0 %v1911_v0  ;;  %v2017_v11 = vld [vmem:[%s306_s8] ss:$0 sm:$0xff]  ;;  %v627_v59 = vpack.c.bf16 %v1596_v58, %v1596_v58  ;;  %s1480_s28 = scalar_lea.vmem %s2260_s0, %s1602_s25  ;;  %s1613_s8 = smul.u32 4294967272, %s1901_s15 }
  0x15   : > { %1693 = vmatprep.subr.bf16.mxu1 %v1911_v0  ;;  %s1638_s6 = sshll.u32 %s1970_s20, 6 }
  0x16   : > { %s1491_s13 = scalar_lea.vmem %s2260_s0, %s1613_s8  ;;  %s2208_s12 = scalar_lea.vmem %s2264_s4, %s1638_s6 }
  0x17   : > { %1682 = vmatpush3.bf16.msra.mxu0 %v1994_v4  ;;  %1690 = vmatmul.mubr.msk.bf16.vlgmr.msra.gmra.mrb[0].mxu1 %vm410_vm2, %v346_v5  ;;  %s1477_s20 = scalar_lea.vmem %s2208_s12, %s1595_s21  ;;  %s999_s24 = scalar_lea.vmem %s2208_s12, %s2105_s30 }
  0x18   : > { %1701 = vmatprep.subr.bf16.mxu0 %v1911_v0  ;;  %1694 = vmatpush3.bf16.msra.mxu1 %v1989_v2 }
  0x19   : > { %1695 = vmatprep.subr.bf16.mxu1 %v1911_v0  ;;  %1697 = vmatprep.mubr.msk.bf16.mxu1 %vm1912_vm1, %v1911_v0 }
  0x1a   : > { %1684 = vmatmul.mubr.msk.bf16.vlgmr.msra.gmra.mrb[0].mxu0 %vm330_vm0, %v347_v7 }
  0x1b   : > { %1702 = vmatpush3.bf16.msra.mxu0 %v1991_v3  ;;  %1703 = vmatprep.mubr.msk.bf16.mxu0 %vm1912_vm1, %v1911_v0 }
  0x1c   : > { %1696 = vmatpush3.bf16.msra.mxu1 %v1994_v4  ;;  %1715 = vmatprep.subr.bf16.mxu0 %v1911_v0 }
  0x1d   : > { %1707 = vmatprep.subr.bf16.mxu1 %v1911_v0 }
  0x22   : > { %1704 = vmatmul.mubr.msk.bf16.vlgmr.msra.gmra.mrb[4].mxu0 %vm410_vm2, %v500_v32 }
  0x23   : > { %1716 = vmatpush3.bf16.msra.mxu0 %v1991_v3  ;;  %1717 = vmatprep.mubr.msk.bf16.mxu0 %vm1912_vm1, %v1911_v0 }
  0x24   : > { %1729 = vmatprep.subr.bf16.mxu0 %v1911_v0 }
  0x2a   : > { %1718 = vmatmul.mubr.msk.bf16.vlgmr.msra.gmra.mrb[8].mxu0 %vm410_vm2, %v627_v59 }
  0x2b   : > { %1730 = vmatpush3.bf16.msra.mxu0 %v1991_v3  ;;  %1731 = vmatprep.mubr.msk.bf16.mxu0 %vm1912_vm1, %v1911_v0 }
  0x2c   : > { %1743 = vmatprep.subr.bf16.mxu0 %v1911_v0 }
  0xea   : > { %v448_v8 = vpop.f32.mrb[0].mxu1 }
  0xeb   : > { %v1691_v9 = vpop.f32.mrb[1].mxu1 }
  0xec   : > { %v451_v10 = vpop.f32.mrb[2].mxu1 }
  0xed   : > { %v398_v12 = vpop.f32.mrb[0].mxu0  ;;  %v1692_v13 = vpop.f32.mrb[3].mxu1 }
  0xee   : > { %v449_v14 = vadd.f32 %v448_v8, %v398_v12  ;;  %v1685_v15 = vpop.f32.mrb[1].mxu0 }
  0xef   : > { %v401_v16 = vpop.f32.mrb[2].mxu0 }
  0xf0   : > { %v460_v17 = vadd.f32 %v2017_v11, %v449_v14  ;;  %v1686_v18 = vpop.f32.mrb[3].mxu0 }
  0xf2   : > { %1823 = vtanh.f32 %v460_v17  ;;  %v1587_v21 = vmul.f32 -1.442695, %v460_v17 }
  0xf4   : > { %1825 = vpow2.f32 %v1587_v21 }
  0xf5   : > { %v585_v37 = vpop.f32.mrb[4].mxu0 }
  0xf6   : > { %v1705_v38 = vpop.f32.mrb[5].mxu0 }
  0xf7   : > { %v588_v39 = vpop.f32.mrb[6].mxu0 }
  0xf8   : > { %v1706_v40 = vpop.f32.mrb[7].mxu0 }
  0xfc   : > { %v1824_v19 = vpop.eup %1823 }
  0xfd   : > { %474 = vrot.lane.b32.xlu0 %v1824_v19, %s1913_s9  ;;  %v712_v1 = vpop.f32.mrb[8].mxu0 }
  0xfe   : > { %v1826_v22 = vpop.eup %1825  ;;  %v1719_v5 = vpop.f32.mrb[9].mxu0 }
  0xff   : > { %v464_v23 = vadd.f32 1.0, %v1826_v22  ;;  %v715_v6 = vpop.f32.mrb[10].mxu0 }
 0x100   : > { %v1720_v7 = vpop.f32.mrb[11].mxu0 }
 0x101   : > { %469 = vrot.lane.b32.xlu0 %v341_v20, %s1913_s9  ;;  %1827 = vrcp.f32 %v464_v23 }
 0x10b   : > { %v1828_v24 = vpop.eup %1827 }
 0x16f   : > { %v475_v25 = vpop.permute.xlu0 %474 }
 0x170   : > { %v477_v26 = vmul.f32 %v1828_v24, %v475_v25 }
 0x172   : > { %479 = vrot.lane.b32.xlu1 %v477_v26, %s1913_s9  ;;  %v1603_v26 = vld [vmem:[%s1480_s28 + $0x18] sm:$0xff] }
 0x173   : > { %v470_v27 = vpop.permute.xlu0 %469 }
 0x174   : > { %v472_v28 = vmul.f32 %v1828_v24, %v470_v27  ;;  %v753_v27 = vpack.c.bf16 %v1603_v26, %v1603_v26 }
 0x176   : > { %1732 = vmatmul.mubr.msk.bf16.vlgmr.msra.gmra.mrb[12].mxu0 %vm410_vm2, %v753_v27 }
 0x177   : > { %1744 = vmatpush3.bf16.msra.mxu0 %v1991_v3  ;;  %1745 = vmatprep.mubr.msk.bf16.mxu0 %vm1912_vm1, %v1911_v0 }
 0x178   : > { %1757 = vmatprep.subr.bf16.mxu0 %v1911_v0 }
 0x1e4   : > { %v480_v29 = vpop.permute.xlu1 %479 }
 0x1e5   : > { %v482_v30 = vadd.f32 %v480_v29, %v472_v28 }
 0x1e7   : > { %1829 = vtanh.f32 %v482_v30 }
 0x1f1   : > { %v1830_v33 = vpop.eup %1829 }
 0x1f2   : > { %485 = vrot.lane.b32.xlu1 %v1830_v33, %s1913_s9 }
 0x249   : > { %v838_v32 = vpop.f32.mrb[12].mxu0 }
 0x24a   : > { %v1733_v33 = vpop.f32.mrb[13].mxu0 }
 0x264   : > { %v486_v34 = vpop.permute.xlu1 %485 }
 0x265   : > { %v2035_v35 = vmul.f32 %v1828_v24, %v486_v34  ;;  %v841_v34 = vpop.f32.mrb[14].mxu0 }
 0x267   : > { %v501_v36 = vpack.c.bf16 %v2035_v35, %v2035_v35 }
 0x269   : > { %503 = vrot.lane.b32.xlu0 %v501_v36, %s1914_s14  ;;  %v1734_v36 = vpop.f32.mrb[15].mxu0 }
 0x2db   : > { %v504_v41 = vpop.permute.xlu0 %503 }
 0x2dc   : > { %1698 = vmatmul.mubr.msk.bf16.vlgmr.msra.gmra.mrb[4].mxu1 %vm330_vm0, %v504_v41 }
 0x2dd   : > { %1708 = vmatpush3.bf16.msra.mxu1 %v1989_v2  ;;  %1711 = vmatprep.mubr.msk.bf16.mxu1 %vm1912_vm1, %v1911_v0 }
 0x2de   : > { %1709 = vmatprep.subr.bf16.mxu1 %v1911_v0 }
 0x2e1   : > { %1710 = vmatpush3.bf16.msra.mxu1 %v1994_v4 }
 0x2e2   : > { %1721 = vmatprep.subr.bf16.mxu1 %v1911_v0 }
 0x3af   : > { %v542_v42 = vpop.f32.mrb[4].mxu1 }
 0x3b0   : > { %v586_v43 = vadd.f32 %v585_v37, %v542_v42  ;;  %v1699_v44 = vpop.f32.mrb[5].mxu1 }
 0x3b1   : > { %v545_v45 = vpop.f32.mrb[6].mxu1 }
 0x3b2   : > { %v591_v46 = vadd.f32 %v2017_v11, %v586_v43  ;;  %v1700_v47 = vpop.f32.mrb[7].mxu1 }
 0x3b4   : > { %1831 = vtanh.f32 %v591_v46  ;;  %v1592_v49 = vmul.f32 -1.442695, %v591_v46 }
 0x3b6   : > { %1833 = vpow2.f32 %v1592_v49 }
 0x3be   : > { %v1832_v48 = vpop.eup %1831 }
 0x3bf   : > { %601 = vrot.lane.b32.xlu1 %v1832_v48, %s1913_s9 }
 0x3c0   : > { %v1834_v50 = vpop.eup %1833 }
 0x3c1   : > { %v595_v51 = vadd.f32 1.0, %v1834_v50 }
 0x3c3   : > { %1835 = vrcp.f32 %v595_v51 }
 0x3cd   : > { %v1836_v52 = vpop.eup %1835 }
 0x3ce   : > { %v599_v55 = vmul.f32 %v1836_v52, %v482_v30 }
 0x431   : > { %v602_v53 = vpop.permute.xlu1 %601 }
 0x432   : > { %v604_v54 = vmul.f32 %v1836_v52, %v602_v53 }
 0x434   : > { %606 = vrot.lane.b32.xlu0 %v604_v54, %s1913_s9  ;;  %v878_v54 = vld [vmem:[%s877_s7] sm:$0xff] }
 0x4a6   : > { %v607_v56 = vpop.permute.xlu0 %606 }
 0x4a7   : > { %v609_v57 = vadd.f32 %v607_v56, %v599_v55  ;;  %v879_v55 = vpack.c.bf16 %v878_v54, %v878_v54 }
 0x4a9   : > { %1837 = vtanh.f32 %v609_v57  ;;  %1746 = vmatmul.mubr.msk.bf16.vlgmr.msra.gmra.mrb[16].mxu0 %vm410_vm2, %v879_v55 }
 0x4aa   : > { %1758 = vmatpush3.bf16.msra.mxu0 %v1991_v3  ;;  %1759 = vmatprep.mubr.msk.bf16.mxu0 %vm1912_vm1, %v1911_v0 }
 0x4ab   : > { %1771 = vmatprep.subr.bf16.mxu0 %v1911_v0 }
 0x4b3   : > { %v1838_v60 = vpop.eup %1837 }
 0x4b4   : > { %612 = vrot.lane.b32.xlu1 %v1838_v60, %s1913_s9 }
 0x526   : > { %v613_v61 = vpop.permute.xlu1 %612 }
 0x527   : > { %v2062_v62 = vmul.f32 %v1836_v52, %v613_v61 }
 0x529   : > { %v628_v63 = vpack.c.bf16 %v2062_v62, %v2062_v62 }
 0x52b   : > { %630 = vrot.lane.b32.xlu0 %v628_v63, %s1914_s14 }
 0x57c   : > { %v964_v60 = vpop.f32.mrb[16].mxu0 }
 0x57d   : > { %v1747_v61 = vpop.f32.mrb[17].mxu0 }
 0x57e   : > { %v967_v63 = vpop.f32.mrb[18].mxu0 }
 0x59d   : > { %v631_v8 = vpop.permute.xlu0 %630 }
 0x59e   : > { %1712 = vmatmul.mubr.msk.bf16.vlgmr.msra.gmra.mrb[8].mxu1 %vm330_vm0, %v631_v8 }
 0x59f   : > { %1722 = vmatpush3.bf16.msra.mxu1 %v1989_v2  ;;  %1725 = vmatprep.mubr.msk.bf16.mxu1 %vm1912_vm1, %v1911_v0 }
 0x5a0   : > { %1723 = vmatprep.subr.bf16.mxu1 %v1911_v0 }
 0x5a3   : > { %1724 = vmatpush3.bf16.msra.mxu1 %v1994_v4 }
 0x5a4   : > { %1735 = vmatprep.subr.bf16.mxu1 %v1911_v0 }
 0x671   : > { %v669_v9 = vpop.f32.mrb[8].mxu1 }
 0x672   : > { %v713_v10 = vadd.f32 %v712_v1, %v669_v9  ;;  %v1713_v12 = vpop.f32.mrb[9].mxu1  ;;  %v1748_v1 = vpop.f32.mrb[19].mxu0 }
 0x673   : > { %v672_v13 = vpop.f32.mrb[10].mxu1 }
 0x674   : > { %v718_v14 = vadd.f32 %v2017_v11, %v713_v10  ;;  %v1714_v15 = vpop.f32.mrb[11].mxu1 }
 0x676   : > { %1839 = vtanh.f32 %v718_v14  ;;  %v1599_v17 = vmul.f32 -1.442695, %v718_v14 }
 0x678   : > { %1841 = vpow2.f32 %v1599_v17 }
 0x680   : > { %v1840_v16 = vpop.eup %1839 }
 0x681   : > { %728 = vrot.lane.b32.xlu1 %v1840_v16, %s1913_s9 }
 0x682   : > { %v1842_v18 = vpop.eup %1841 }
 0x683   : > { %v722_v19 = vadd.f32 1.0, %v1842_v18 }
 0x685   : > { %1843 = vrcp.f32 %v722_v19 }
 0x68f   : > { %v1844_v20 = vpop.eup %1843 }
 0x690   : > { %v726_v23 = vmul.f32 %v1844_v20, %v609_v57 }
 0x6f3   : > { %v729_v21 = vpop.permute.xlu1 %728 }
 0x6f4   : > { %v731_v22 = vmul.f32 %v1844_v20, %v729_v21 }
 0x6f6   : > { %733 = vrot.lane.b32.xlu0 %v731_v22, %s1913_s9 }
 0x768   : > { %v734_v24 = vpop.permute.xlu0 %733 }
 0x769   : > { %v736_v25 = vadd.f32 %v734_v24, %v726_v23  ;;  %v1614_v23 = vld [vmem:[%s1491_s13 + $0x28] sm:$0xff]  ;;  %s493_s13 = scalar_lea.vmem %s2208_s12, %s1580_s19  ;;  %s1469_s19 = scalar_lea.vmem %s2208_s12, %s1588_s10 }
 0x76a   : > { %v1006_v24 = vpack.c.bf16 %v1614_v23, %v1614_v23  ;;  %s1503_s10 = scalar_lea.vmem %s2208_s12, %s1620_s22 }
 0x76b   : > { %1845 = vtanh.f32 %v736_v25 }
 0x76c   : > { %1760 = vmatmul.mubr.msk.bf16.vlgmr.msra.gmra.mrb[20].mxu0 %vm410_vm2, %v1006_v24 }
 0x76d   : > { %1772 = vmatpush3.bf16.msra.mxu0 %v1991_v3  ;;  %1773 = vmatprep.mubr.msk.bf16.mxu0 %vm1912_vm1, %v1911_v0 }
 0x76e   : > { %1785 = vmatprep.subr.bf16.mxu0 %v1911_v0 }
 0x775   : > { %v1846_v28 = vpop.eup %1845 }
 0x776   : > { %739 = vrot.lane.b32.xlu1 %v1846_v28, %s1913_s9 }
 0x7e8   : > { %v740_v29 = vpop.permute.xlu1 %739 }
 0x7e9   : > { %v2089_v30 = vmul.f32 %v1844_v20, %v740_v29 }
 0x7eb   : > { %v754_v31 = vpack.c.bf16 %v2089_v30, %v2089_v30 }
 0x7ed   : > { %756 = vrot.lane.b32.xlu0 %v754_v31, %s1914_s14 }
 0x83f   : > { %v1091_v29 = vpop.f32.mrb[20].mxu0 }
 0x840   : > { %v1761_v31 = vpop.f32.mrb[21].mxu0 }
 0x85f   : > { %v757_v37 = vpop.permute.xlu0 %756 }
 0x860   : > { %1726 = vmatmul.mubr.msk.bf16.vlgmr.msra.gmra.mrb[12].mxu1 %vm330_vm0, %v757_v37 }
 0x861   : > { %1736 = vmatpush3.bf16.msra.mxu1 %v1989_v2  ;;  %1739 = vmatprep.mubr.msk.bf16.mxu1 %vm1912_vm1, %v1911_v0 }
 0x862   : > { %1737 = vmatprep.subr.bf16.mxu1 %v1911_v0 }
 0x865   : > { %1738 = vmatpush3.bf16.msra.mxu1 %v1994_v4 }
 0x866   : > { %1749 = vmatprep.subr.bf16.mxu1 %v1911_v0 }
 0x933   : > { %v795_v38 = vpop.f32.mrb[12].mxu1 }
 0x934   : > { %v839_v39 = vadd.f32 %v838_v32, %v795_v38  ;;  %v1727_v40 = vpop.f32.mrb[13].mxu1  ;;  %v1094_v32 = vpop.f32.mrb[22].mxu0 }
 0x935   : > { %v798_v41 = vpop.f32.mrb[14].mxu1  ;;  %v1762_v33 = vpop.f32.mrb[23].mxu0 }
 0x936   : > { %v844_v42 = vadd.f32 %v2017_v11, %v839_v39  ;;  %v1728_v43 = vpop.f32.mrb[15].mxu1 }
 0x938   : > { %1847 = vtanh.f32 %v844_v42  ;;  %v1606_v45 = vmul.f32 -1.442695, %v844_v42 }
 0x93a   : > { %1849 = vpow2.f32 %v1606_v45 }
 0x942   : > { %v1848_v44 = vpop.eup %1847 }
 0x943   : > { %854 = vrot.lane.b32.xlu1 %v1848_v44, %s1913_s9 }
 0x944   : > { %v1850_v46 = vpop.eup %1849 }
 0x945   : > { %v848_v47 = vadd.f32 1.0, %v1850_v46 }
 0x947   : > { %1851 = vrcp.f32 %v848_v47 }
 0x951   : > { %v1852_v48 = vpop.eup %1851 }
 0x952   : > { %v852_v51 = vmul.f32 %v1852_v48, %v736_v25 }
 0x9b5   : > { %v855_v49 = vpop.permute.xlu1 %854 }
 0x9b6   : > { %v857_v50 = vmul.f32 %v1852_v48, %v855_v49 }
 0x9b8   : > { %859 = vrot.lane.b32.xlu0 %v857_v50, %s1913_s9 }
 0xa2a   : > { %v860_v52 = vpop.permute.xlu0 %859 }
 0xa2b   : > { %v862_v53 = vadd.f32 %v860_v52, %v852_v51  ;;  %v1621_v52 = vld [vmem:[%s1499_s26 + $0x30] sm:$0xff]  ;;  %s1495_s26 = scalar_lea.vmem %s2208_s12, %s1613_s8 }
 0xa2d   : > { %1853 = vtanh.f32 %v862_v53 }
 0xa37   : > { %v1854_v56 = vpop.eup %1853 }
 0xa38   : > { %865 = vrot.lane.b32.xlu1 %v1854_v56, %s1913_s9 }
 0xaaa   : > { %v866_v57 = vpop.permute.xlu1 %865 }
 0xaab   : > { %v2117_v58 = vmul.f32 %v1852_v48, %v866_v57 }
 0xaad   : > { %v880_v59 = vpack.c.bf16 %v2117_v58, %v2117_v58 }
 0xaaf   : > { %882 = vrot.lane.b32.xlu0 %v880_v59, %s1914_s14 }
 0xb21   : > { %v883_v5 = vpop.permute.xlu0 %882 }
 0xb22   : > { %1740 = vmatmul.mubr.msk.bf16.vlgmr.msra.gmra.mrb[16].mxu1 %vm330_vm0, %v883_v5 }
 0xb23   : > { %1750 = vmatpush3.bf16.msra.mxu1 %v1989_v2  ;;  %1753 = vmatprep.mubr.msk.bf16.mxu1 %vm1912_vm1, %v1911_v0 }
 0xb24   : > { %1751 = vmatprep.subr.bf16.mxu1 %v1911_v0 }
 0xb27   : > { %1752 = vmatpush3.bf16.msra.mxu1 %v1994_v4 }
 0xb28   : > { %1763 = vmatprep.subr.bf16.mxu1 %v1911_v0 }
 0xbf5   : > { %v921_v6 = vpop.f32.mrb[16].mxu1 }
 0xbf6   : > { %v965_v7 = vadd.f32 %v964_v60, %v921_v6  ;;  %v1741_v8 = vpop.f32.mrb[17].mxu1 }
 0xbf7   : > { %v924_v9 = vpop.f32.mrb[18].mxu1 }
 0xbf8   : > { %v970_v10 = vadd.f32 %v2017_v11, %v965_v7  ;;  %v1742_v12 = vpop.f32.mrb[19].mxu1 }
 0xbfa   : > { %1855 = vtanh.f32 %v970_v10  ;;  %v1612_v14 = vmul.f32 -1.442695, %v970_v10 }
 0xbfc   : > { %1857 = vpow2.f32 %v1612_v14 }
 0xc04   : > { %v1856_v13 = vpop.eup %1855 }
 0xc05   : > { %980 = vrot.lane.b32.xlu1 %v1856_v13, %s1913_s9 }
 0xc06   : > { %v1858_v15 = vpop.eup %1857 }
 0xc07   : > { %v974_v16 = vadd.f32 1.0, %v1858_v15 }
 0xc09   : > { %1859 = vrcp.f32 %v974_v16 }
 0xc13   : > { %v1860_v17 = vpop.eup %1859 }
 0xc14   : > { %v978_v20 = vmul.f32 %v1860_v17, %v862_v53  ;;  %v1133_v53 = vpack.c.bf16 %v1621_v52, %v1621_v52 }
 0xc16   : > { %1774 = vmatmul.mubr.msk.bf16.vlgmr.msra.gmra.mrb[24].mxu0 %vm410_vm2, %v1133_v53 }
 0xc17   : > { %1786 = vmatpush3.bf16.msra.mxu0 %v1991_v3  ;;  %1787 = vmatprep.mubr.msk.bf16.mxu0 %vm1912_vm1, %v1911_v0 }
 0xc77   : > { %v981_v18 = vpop.permute.xlu1 %980 }
 0xc78   : > { %v983_v19 = vmul.f32 %v1860_v17, %v981_v18  ;;  %v1628_v18 = vld [vmem:[%s1507_s5 + $0x38] sm:$0xff] }
 0xc7a   : > { %985 = vrot.lane.b32.xlu0 %v983_v19, %s1913_s9  ;;  %v1260_v19 = vpack.c.bf16 %v1628_v18, %v1628_v18 }
 0xc7c   : > { %1788 = vmatmul.mubr.msk.bf16.vlgmr.msra.gmra.mrb[28].mxu0 %vm410_vm2, %v1260_v19 }
 0xce9   : > { %v1218_v59 = vpop.f32.mrb[24].mxu0 }
 0xcea   : > { %v1775_v60 = vpop.f32.mrb[25].mxu0 }
 0xceb   : > { %v1221_v61 = vpop.f32.mrb[26].mxu0 }
 0xcec   : > { %v986_v21 = vpop.permute.xlu0 %985  ;;  %v1776_v63 = vpop.f32.mrb[27].mxu0 }
 0xced   : > { %v988_v22 = vadd.f32 %v986_v21, %v978_v20 }
 0xcef   : > { %1861 = vtanh.f32 %v988_v22 }
 0xcf9   : > { %v1862_v25 = vpop.eup %1861 }
 0xcfa   : > { %991 = vrot.lane.b32.xlu1 %v1862_v25, %s1913_s9 }
 0xd4f   : > { %v1345_v24 = vpop.f32.mrb[28].mxu0 }
 0xd50   : > { %v1789_v25 = vpop.f32.mrb[29].mxu0 }
 0xd6c   : > { %v992_v26 = vpop.permute.xlu1 %991 }
 0xd6d   : > { %v2144_v27 = vmul.f32 %v1860_v17, %v992_v26  ;;  %v1348_v26 = vpop.f32.mrb[30].mxu0 }
 0xd6f   : > { %v1007_v28 = vpack.c.bf16 %v2144_v27, %v2144_v27 }
 0xd71   : > { %1009 = vrot.lane.b32.xlu0 %v1007_v28, %s1914_s14  ;;  %v1790_v28 = vpop.f32.mrb[31].mxu0 }
 0xde3   : > { %v1010_v34 = vpop.permute.xlu0 %1009 }
 0xde4   : > { %1754 = vmatmul.mubr.msk.bf16.vlgmr.msra.gmra.mrb[20].mxu1 %vm330_vm0, %v1010_v34 }
 0xde5   : > { %1764 = vmatpush3.bf16.msra.mxu1 %v1989_v2  ;;  %1767 = vmatprep.mubr.msk.bf16.mxu1 %vm1912_vm1, %v1911_v0 }
 0xde6   : > { %1765 = vmatprep.subr.bf16.mxu1 %v1911_v0 }
 0xde9   : > { %1766 = vmatpush3.bf16.msra.mxu1 %v1994_v4 }
 0xdea   : > { %1777 = vmatprep.subr.bf16.mxu1 %v1911_v0 }
 0xeb7   : > { %v1048_v36 = vpop.f32.mrb[20].mxu1 }
 0xeb8   : > { %v1092_v37 = vadd.f32 %v1091_v29, %v1048_v36  ;;  %v1755_v38 = vpop.f32.mrb[21].mxu1 }
 0xeb9   : > { %v1051_v39 = vpop.f32.mrb[22].mxu1 }
 0xeba   : > { %v1097_v40 = vadd.f32 %v2017_v11, %v1092_v37  ;;  %v1756_v41 = vpop.f32.mrb[23].mxu1 }
 0xebc   : > { %1863 = vtanh.f32 %v1097_v40  ;;  %v1617_v43 = vmul.f32 -1.442695, %v1097_v40 }
 0xebe   : > { %1865 = vpow2.f32 %v1617_v43 }
 0xec6   : > { %v1864_v42 = vpop.eup %1863 }
 0xec7   : > { %1107 = vrot.lane.b32.xlu1 %v1864_v42, %s1913_s9 }
 0xec8   : > { %v1866_v44 = vpop.eup %1865 }
 0xec9   : > { %v1101_v45 = vadd.f32 1.0, %v1866_v44 }
 0xecb   : > { %1867 = vrcp.f32 %v1101_v45 }
 0xed5   : > { %v1868_v46 = vpop.eup %1867 }
 0xed6   : > { %v1105_v49 = vmul.f32 %v1868_v46, %v988_v22 }
 0xf39   : > { %v1108_v47 = vpop.permute.xlu1 %1107 }
 0xf3a   : > { %v1110_v48 = vmul.f32 %v1868_v46, %v1108_v47 }
 0xf3c   : > { %1112 = vrot.lane.b32.xlu0 %v1110_v48, %s1913_s9 }
 0xfae   : > { %v1113_v50 = vpop.permute.xlu0 %1112 }
 0xfaf   : > { %v1115_v51 = vadd.f32 %v1113_v50, %v1105_v49 }
 0xfb1   : > { %1869 = vtanh.f32 %v1115_v51 }
 0xfbb   : > { %v1870_v54 = vpop.eup %1869 }
 0xfbc   : > { %1118 = vrot.lane.b32.xlu1 %v1870_v54, %s1913_s9 }
0x102e   : > { %v1119_v55 = vpop.permute.xlu1 %1118 }
0x102f   : > { %v2170_v56 = vmul.f32 %v1868_v46, %v1119_v55 }
0x1031   : > { %v1134_v57 = vpack.c.bf16 %v2170_v56, %v2170_v56 }
0x1033   : > { %1136 = vrot.lane.b32.xlu0 %v1134_v57, %s1914_s14 }
0x10a5   : > { %v1137_v1 = vpop.permute.xlu0 %1136 }
0x10a6   : > { %1768 = vmatmul.mubr.msk.bf16.vlgmr.msra.gmra.mrb[24].mxu1 %vm330_vm0, %v1137_v1 }
0x10a7   : > { %1778 = vmatpush3.bf16.msra.mxu1 %v1989_v2  ;;  %1781 = vmatprep.mubr.msk.bf16.mxu1 %vm1912_vm1, %v1911_v0 }
0x10a8   : > { %1779 = vmatprep.subr.bf16.mxu1 %v1911_v0 }
0x10ab   : > { %1780 = vmatpush3.bf16.msra.mxu1 %v1994_v4 }
0x1179   : > { %v1175_v3 = vpop.f32.mrb[24].mxu1 }
0x117a   : > { %v1219_v5 = vadd.f32 %v1218_v59, %v1175_v3  ;;  %v1769_v6 = vpop.f32.mrb[25].mxu1 }
0x117b   : > { %v1178_v7 = vpop.f32.mrb[26].mxu1 }
0x117c   : > { %v1224_v8 = vadd.f32 %v2017_v11, %v1219_v5  ;;  %v1770_v9 = vpop.f32.mrb[27].mxu1 }
0x117e   : > { %1871 = vtanh.f32 %v1224_v8  ;;  %v1624_v2 = vmul.f32 -1.442695, %v1224_v8 }
0x1180   : > { %1873 = vpow2.f32 %v1624_v2 }
0x1188   : > { %v1872_v10 = vpop.eup %1871 }
0x1189   : > { %1234 = vrot.lane.b32.xlu1 %v1872_v10, %s1913_s9 }
0x118a   : > { %v1874_v12 = vpop.eup %1873 }
0x118b   : > { %v1228_v13 = vadd.f32 1.0, %v1874_v12 }
0x118d   : > { %1875 = vrcp.f32 %v1228_v13 }
0x1197   : > { %v1876_v0 = vpop.eup %1875 }
0x1198   : > { %v1232_v15 = vmul.f32 %v1876_v0, %v1115_v51 }
0x11fb   : > { %v1235_v4 = vpop.permute.xlu1 %1234 }
0x11fc   : > { %v1237_v14 = vmul.f32 %v1876_v0, %v1235_v4 }
0x11fe   : > { %1239 = vrot.lane.b32.xlu0 %v1237_v14, %s1913_s9 }
0x1270   : > { %v1240_v16 = vpop.permute.xlu0 %1239 }
0x1271   : > { %v1242_v17 = vadd.f32 %v1240_v16, %v1232_v15 }
0x1273   : > { %1877 = vtanh.f32 %v1242_v17 }
0x127d   : > { %v1878_v20 = vpop.eup %1877 }
0x127e   : > { %1245 = vrot.lane.b32.xlu1 %v1878_v20, %s1913_s9 }
0x12f0   : > { %v1246_v21 = vpop.permute.xlu1 %1245 }
0x12f1   : > { %v1248_v22 = vmul.f32 %v1876_v0, %v1246_v21 }
0x12f3   : > { %v1261_v23 = vpack.c.bf16 %v1248_v22, %v1248_v22 }
0x12f5   : > { %1263 = vrot.lane.b32.xlu0 %v1261_v23, %s1914_s14 }
0x1367   : > { %v1264_v29 = vpop.permute.xlu0 %1263 }
0x1368   : > { %1782 = vmatmul.mubr.msk.bf16.vlgmr.msra.gmra.mrb[28].mxu1 %vm330_vm0, %v1264_v29 }
0x143b   : > { %v1302_v31 = vpop.f32.mrb[28].mxu1 }
0x143c   : > { %v1346_v32 = vadd.f32 %v1345_v24, %v1302_v31  ;;  %v1783_v33 = vpop.f32.mrb[29].mxu1 }
0x143d   : > { %v1305_v34 = vpop.f32.mrb[30].mxu1 }
0x143e   : > { %v1351_v36 = vadd.f32 %v2017_v11, %v1346_v32  ;;  %v1784_v37 = vpop.f32.mrb[31].mxu1 }
0x1440   : > { %1879 = vtanh.f32 %v1351_v36  ;;  %v1631_v39 = vmul.f32 -1.442695, %v1351_v36 }
0x1442   : > { %1881 = vpow2.f32 %v1631_v39 }
0x144a   : > { %v1880_v38 = vpop.eup %1879 }
0x144b   : > { %1361 = vrot.lane.b32.xlu1 %v1880_v38, %s1913_s9 }
0x144c   : > { %v1882_v40 = vpop.eup %1881 }
0x144d   : > { %v1355_v41 = vadd.f32 1.0, %v1882_v40 }
0x144f   : > { %1883 = vrcp.f32 %v1355_v41 }
0x1459   : > { %v1884_v42 = vpop.eup %1883 }
0x145a   : > { %v1359_v11 = vmul.f32 %v1884_v42, %v1242_v17 }
0x14bd   : > { %v1362_v43 = vpop.permute.xlu1 %1361 }
0x14be   : > { %v1364_v44 = vmul.f32 %v1884_v42, %v1362_v43 }
0x14c0   : > { %1366 = vrot.lane.b32.xlu0 %v1364_v44, %s1913_s9 }
0x14c4   : > { %490 = vrot.lane.b32.xlu0 %v2035_v35, %s1914_s14 }
0x14c8   : > { %744 = vrot.lane.b32.xlu0 %v2089_v30, %s1914_s14 }
0x14cc   : > { %996 = vrot.lane.b32.xlu0 %v2144_v27, %s1914_s14 }
0x14d0   : > { %1250 = vrot.lane.b32.xlu0 %v1248_v22, %s1914_s14 }
0x1532   : > { %v1367_v45 = vpop.permute.xlu0 %1366 }
0x1533   : > { %v1369_v46 = vadd.f32 %v1367_v45, %v1359_v11 }
0x1535   : > { %1885 = vtanh.f32 %v1369_v46  ;;  %1384 = vrot.lane.b32.xlu0 %v1369_v46, %s1915_s23 }
0x1536   : > { %v491_v35 = vpop.permute.xlu0 %490 }
0x1537   : > { %494 = vst.msk [vmem:[%s493_s13] sm:$0xff] %vm330_vm0, %v491_v35 }
0x153a   : > { %v745_v27 = vpop.permute.xlu0 %744 }
0x153e   : > { %v997_v47 = vpop.permute.xlu0 %996 }
0x153f   : > { %v1886_v30 = vpop.eup %1885 }
0x1540   : > { %1372 = vrot.lane.b32.xlu1 %v1886_v30, %s1913_s9  ;;  %s1483_s9 = scalar_lea.vmem %s2208_s12, %s1602_s25 }
0x1542   : > { %v1251_v48 = vpop.permute.xlu0 %1250 }
0x1544   : > { %617 = vrot.lane.b32.xlu1 %v2062_v62, %s1914_s14 }
0x1548   : > { %870 = vrot.lane.b32.xlu1 %v2117_v58, %s1914_s14 }
0x154c   : > { %1123 = vrot.lane.b32.xlu1 %v2170_v56, %s1914_s14 }
0x15a7   : > { %v1385_v49 = vpop.permute.xlu0 %1384 }
0x15a8   : > { %1387 = vst.msk [vmem:[#allocation3] sm:$0xff] %vm330_vm0, %v1385_v49 }
0x15b2   : > { %v1373_v50 = vpop.permute.xlu1 %1372 }
0x15b3   : > { %v1375_v62 = vmul.f32 %v1884_v42, %v1373_v50 }
0x15b5   : > { %1377 = vrot.lane.b32.xlu1 %v1375_v62, %s1914_s14  ;;  %s1511_s14 = scalar_lea.vmem %s2208_s12, %s1627_s27 }
0x15b6   : > { %v618_v58 = vpop.permute.xlu1 %617 }
0x15b7   : > { %1594 = vst.msk [vmem:[%s1469_s19 + $0x8] sm:$0xff] %vm330_vm0, %v618_v58 }
0x15b8   : > { %1601 = vst.msk [vmem:[%s1477_s20 + $0x10] sm:$0xff] %vm330_vm0, %v745_v27 }
0x15ba   : > { %v871_v51 = vpop.permute.xlu1 %870 }
0x15bb   : > { %1608 = vst.msk [vmem:[%s1483_s9 + $0x18] sm:$0xff] %vm330_vm0, %v871_v51 }
0x15bc   : > { %1000 = vst.msk [vmem:[%s999_s24] sm:$0xff] %vm330_vm0, %v997_v47 }
0x15be   : > { %v1124_v52 = vpop.permute.xlu1 %1123 }
0x15bf   : > { %1619 = vst.msk [vmem:[%s1495_s26 + $0x28] sm:$0xff] %vm330_vm0, %v1124_v52 }
0x15c0   : > { %1626 = vst.msk [vmem:[%s1503_s10 + $0x30] sm:$0xff] %vm330_vm0, %v1251_v48 }
0x1627   : > { %v1378_v53 = vpop.permute.xlu1 %1377 }
0x1628   : > { %1633 = vst.msk [vmem:[%s1511_s14 + $0x38] sm:$0xff] %vm330_vm0, %v1378_v53  ;;  %1382 = vst.msk [vmem:[#allocation2] sm:$0xff] %vm330_vm0, %v1378_v53 }
0x1629 PF: > { %s14_s17 = sadd.s32 1, %s1909_s17   ;;  %s2265_s15 = smov %s1905_s16 }
0x162a   : > { %p11_p5 = scmp.ge.s32.totalorder %s14_s17, 4   ;;  %s2266_s16 = smov %s2268_s18 }
0x162c   :  { %13 = sbr.rel (!%p11_p5) target bundleno = 2 (0x2), region = 95 }

// kernel: bidirectional_lstm.3
= control target key start
LH: loop header
LB: loop body
LE: loop exit
PB: predicated region body
PF: predicated region fallthrough
CT: control target
= control target key end

     0   :  { %s2043_s15 = smov 0   ;;  %s2045_s16 = smov 0   ;;  %s2416_s0 = inlined_call_operand.vmem [shape: f32[8,8,64], index: 0, kind: input, shape index: {}]   ;;  %s2417_s1 = inlined_call_operand.vmem [shape: bf16[2,64,128], index: 1, kind: input, shape index: {}]   ;;  %s2418_s2 = inlined_call_operand.vmem [shape: bf16[2,32,128], index: 2, kind: input, shape index: {}]   ;;  %s2419_s3 = inlined_call_operand.vmem [shape: f32[2,1,128], index: 3, kind: input, shape index: {}]   ;;  %s2420_s4 = inlined_call_operand.vmem [shape: f32[2,8,8,32], index: 4, kind: output, shape index: {}]  }
   0x1   :  { %s2047_s17 = smov 0  }
   0x2 LB: > { %s26_s18 = sadd.s32 1, %s2007_s16  ;;  %p1597_p0 = scmp.ge.s32.totalorder %s2011_s17, 1  ;;  %s2011_s17 = sphi %s2047_s17, %s14_s17   ;;  %s2007_s16 = sphi %s2045_s16, %s2422_s16   ;;  %s2003_s15 = sphi %s2043_s15, %s2421_s15  }
   0x3   : > { %p28_p1 = scmp.ge.s32.totalorder %s26_s18, 2  ;;  %p229_p2 = scmp.lt.s32.totalorder %s2011_s17, 3 }
   0x5   : > { %s2424_s18 = smov (%p28_p1, %s26_s18), 0  ;;  %p230_p3 = pnand %p1597_p0, %p229_p2 }
   0x6   : > { %p294_p4 = scmp.lt.s32.totalorder (!%p230_p3), %s2003_s15, 1  ;;  %vm330_vm0 = vcmask (!%p230_p3), 261120   ;;  %v2013_v0 = vmov (!%p230_p3), 0.0   ;;  %vm2014_vm1 = vmmov (!%p230_p3), 0   ;;  %s1604_s28 = smul.u32 (!%p230_p3), 56, %s2003_s15  ;;  %vm434_vm2 = vcmask (!%p230_p3), 523264  }
   0x7   : > { %233 = sbr.rel (%p230_p3) target bundleno = 5801 (0x16a9), region = 36  ;;  %1730 = vmatprep.subr.bf16.mxu1 (!%p230_p3), %v2013_v0  ;;  %1734 = vmatprep.mubr.msk.bf16.mxu1 (!%p230_p3), %vm2014_vm1, %v2013_v0  ;;  %331 = vst.msk [vmem:[#allocation2] sm:$0xff] (!%p230_p3), %vm330_vm0, %v2013_v0  ;;  %332 = vst.msk [vmem:[#allocation3] sm:$0xff] (!%p230_p3), %vm330_vm0, %v2013_v0  ;;  %s2015_s9 = smov (!%p230_p3), 32  }
   0x8   : > { %1750 = vmatprep.subr.bf16.mxu0 (!%p230_p3), %v2013_v0  ;;  %1754 = vmatprep.mubr.msk.bf16.mxu0 (!%p230_p3), %vm2014_vm1, %v2013_v0  ;;  %s350_s5 = scalar_lea.vmem (!%p230_p3), %s2416_s0, %s1604_s28  ;;  %s2016_s10 = smov (!%p230_p3), 64  }
   0x9   : > { %v351_v9 = vld [vmem:[%s350_s5] sm:$0xff] (!%p230_p3)  ;;  %s1615_s11 = smul.u32 (!%p230_p3), 40, %s2003_s15  ;;  %s899_s29 = ssub.s32 (!%p230_p3), 4, %s2003_s15 }
   0xa   : > { %v352_v10 = vpack.c.bf16 (!%p230_p3), %v351_v9, %v351_v9  ;;  %s2250_s30 = sshll.u32 (!%p230_p3), %s899_s29, 3  ;;  %s1654_s26 = smul.u32 (!%p230_p3), 4294967240, %s2003_s15 }
   0xb   : > { %s1489_s14 = scalar_lea.vmem (!%p230_p3), %s2416_s0, %s1615_s11  ;;  %s901_s7 = scalar_lea.vmem (!%p230_p3), %s2416_s0, %s2250_s30 }
   0xc   : > { %v1616_v39 = vld [vmem:[%s1489_s14 + $0x8] sm:$0xff] (!%p230_p3)  ;;  %s1531_s5 = scalar_lea.vmem (!%p230_p3), %s2416_s0, %s1654_s26  ;;  %s2017_s22 = smov (!%p230_p3), 96  }
   0xd   : > { %v524_v40 = vpack.c.bf16 (!%p230_p3), %v1616_v39, %v1616_v39 }
   0xe   : > { %s2072_s19 = scalar_select %p294_p4, %s2003_s15, 1  ;;  %v346_v3 = vld [vmem:[#allocation2] sm:$0xff]  ;;  %v347_v23 = vld [vmem:[#allocation3] sm:$0xff] }
   0xf   : > { %v353_v4 = vpack.c.bf16 %v346_v3, %v346_v3 }
  0x10   : > { %s1664_s20 = sshll.u32 %s2072_s19, 4  ;;  %s1663_s21 = sshll.u32 %s2072_s19, 5 }
  0x11   : > { %s303_s24 = scalar_lea.vmem %s2418_s2, %s1664_s20  ;;  %s298_s27 = scalar_lea.vmem %s2417_s1, %s1663_s21 }
  0x12   : > { %v2082_v1 = vld [vmem:[%s303_s24] sm:$0xff]   ;;  %v2084_v2 = vld [vmem:[%s303_s24 + $0x8] sm:$0xff]   ;;  %v2108_v7 = vld [vmem:[%s298_s27 + $0x10] sm:$0xff]   ;;  %s306_s8 = scalar_lea.vmem %s2419_s3, %s2072_s19  ;;  %s1622_s20 = smul.u32 24, %s2003_s15 }
  0x13   : > { %1731 = vmatpush3.bf16.msra.mxu1 %v2082_v1  ;;  %1751 = vmatpush3.bf16.msra.mxu0 %v2082_v1  ;;  %v2094_v5 = vld [vmem:[%s298_s27] sm:$0xff]   ;;  %v2101_v6 = vld [vmem:[%s298_s27 + $0x8] sm:$0xff]   ;;  %v2117_v8 = vld [vmem:[%s298_s27 + $0x18] sm:$0xff]   ;;  %s1629_s24 = sshll.u32 %s2003_s15, 3  ;;  %s1647_s21 = smul.u32 4294967256, %s2003_s15 }
  0x14   : > { %1732 = vmatprep.subr.bf16.mxu1 %v2013_v0  ;;  %1752 = vmatprep.subr.bf16.mxu0 %v2013_v0  ;;  %v2133_v15 = vld [vmem:[%s306_s8] ss:$0 sm:$0xff]  ;;  %s1497_s23 = scalar_lea.vmem %s2416_s0, %s1622_s20  ;;  %s1504_s27 = scalar_lea.vmem %s2416_s0, %s1629_s24 }
  0x15   : > { %v1623_v9 = vld [vmem:[%s1497_s23 + $0x10] sm:$0xff]  ;;  %s1640_s8 = smul.u32 4294967272, %s2003_s15  ;;  %s1523_s25 = scalar_lea.vmem %s2416_s0, %s1647_s21 }
  0x16   : > { %s1665_s6 = sshll.u32 %s2072_s19, 6 }
  0x17   : > { %1733 = vmatpush3.bf16.msra.mxu1 %v2084_v2  ;;  %1753 = vmatpush3.bf16.msra.mxu0 %v2084_v2  ;;  %s1515_s14 = scalar_lea.vmem %s2416_s0, %s1640_s8  ;;  %s2364_s13 = scalar_lea.vmem %s2420_s4, %s1665_s6 }
  0x18   : > { %1738 = vmatprep.subr.bf16.mxu1 %v2013_v0  ;;  %1758 = vmatprep.subr.bf16.mxu0 %v2013_v0  ;;  %s1493_s19 = scalar_lea.vmem %s2364_s13, %s1615_s11  ;;  %s1023_s23 = scalar_lea.vmem %s2364_s13, %s2250_s30 }
  0x19   : > { %s1527_s11 = scalar_lea.vmem %s2364_s13, %s1647_s21 }
  0x1a   : > { %1735 = vmatmul.mubr.msk.bf16.vlgmr.msra.gmra.mrb[0].mxu1 %vm330_vm0, %v353_v4 }
  0x1b   : > { %1739 = vmatpush3.bf16.msra.mxu1 %v2094_v5  ;;  %1746 = vmatprep.mubr.msk.bf16.mxu1 %vm2014_vm1, %v2013_v0 }
  0x1c   : > { %1740 = vmatprep.subr.bf16.mxu1 %v2013_v0 }
  0x1f   : > { %1741 = vmatpush3.bf16.msra.mxu1 %v2101_v6 }
  0x20   : > { %1742 = vmatprep.subr.bf16.mxu1 %v2013_v0 }
  0x23   : > { %1743 = vmatpush3.bf16.msra.mxu1 %v2108_v7 }
  0x24   : > { %1744 = vmatprep.subr.bf16.mxu1 %v2013_v0 }
  0x27   : > { %1745 = vmatpush3.bf16.msra.mxu1 %v2117_v8 }
  0x28   : > { %1770 = vmatprep.subr.bf16.mxu1 %v2013_v0 }
  0x2a   : > { %1747 = vmatmul.mubr.msk.bf16.vlgmr.msra.gmra.mrb[4].mxu1 %vm434_vm2, %v352_v10  ;;  %v651_v10 = vpack.c.bf16 %v1623_v9, %v1623_v9  ;;  %v902_v9 = vld [vmem:[%s901_s7] sm:$0xff] }
  0x2b   : > { %1771 = vmatpush3.bf16.msra.mxu1 %v2082_v1  ;;  %1774 = vmatprep.mubr.msk.bf16.mxu1 %vm2014_vm1, %v2013_v0 }
  0x2c   : > { %1772 = vmatprep.subr.bf16.mxu1 %v2013_v0 }
  0x2f   : > { %1773 = vmatpush3.bf16.msra.mxu1 %v2084_v2 }
  0x30   : > { %1778 = vmatprep.subr.bf16.mxu1 %v2013_v0 }
  0xed   : > { %v404_v11 = vpop.f32.mrb[0].mxu1 }
  0xee   : > { %v1736_v12 = vpop.f32.mrb[1].mxu1 }
  0xef   : > { %v407_v13 = vpop.f32.mrb[2].mxu1 }
  0xf0   : > { %v1737_v14 = vpop.f32.mrb[3].mxu1 }
  0xfd   : > { %v472_v16 = vpop.f32.mrb[4].mxu1 }
  0xfe   : > { %v473_v17 = vadd.f32 %v472_v16, %v404_v11  ;;  %v1748_v18 = vpop.f32.mrb[5].mxu1 }
  0xff   : > { %v475_v19 = vpop.f32.mrb[6].mxu1 }
 0x100   : > { %v484_v20 = vadd.f32 %v2133_v15, %v473_v17  ;;  %v1749_v21 = vpop.f32.mrb[7].mxu1 }
 0x102   : > { %1925 = vtanh.f32 %v484_v20  ;;  %v1614_v24 = vmul.f32 -1.442695, %v484_v20 }
 0x104   : > { %1927 = vpow2.f32 %v1614_v24 }
 0x10c   : > { %v1926_v22 = vpop.eup %1925 }
 0x10d   : > { %498 = vrot.lane.b32.xlu0 %v1926_v22, %s2015_s9 }
 0x10e   : > { %v1928_v25 = vpop.eup %1927 }
 0x10f   : > { %v488_v26 = vadd.f32 1.0, %v1928_v25 }
 0x111   : > { %493 = vrot.lane.b32.xlu0 %v347_v23, %s2015_s9  ;;  %1929 = vrcp.f32 %v488_v26 }
 0x11b   : > { %v1930_v27 = vpop.eup %1929 }
 0x17f   : > { %v499_v28 = vpop.permute.xlu0 %498 }
 0x180   : > { %v501_v29 = vmul.f32 %v1930_v27, %v499_v28 }
 0x182   : > { %503 = vrot.lane.b32.xlu1 %v501_v29, %s2015_s9 }
 0x183   : > { %v494_v30 = vpop.permute.xlu0 %493 }
 0x184   : > { %v496_v31 = vmul.f32 %v1930_v27, %v494_v30 }
 0x1f4   : > { %v504_v32 = vpop.permute.xlu1 %503 }
 0x1f5   : > { %v506_v33 = vadd.f32 %v504_v32, %v496_v31 }
 0x1f7   : > { %1931 = vtanh.f32 %v506_v33 }
 0x201   : > { %v1932_v34 = vpop.eup %1931 }
 0x202   : > { %509 = vrot.lane.b32.xlu1 %v1932_v34, %s2015_s9 }
 0x274   : > { %v510_v35 = vpop.permute.xlu1 %509 }
 0x275   : > { %v2140_v36 = vmul.f32 %v1930_v27, %v510_v35 }
 0x277   : > { %v525_v37 = vpack.c.bf16 %v2140_v36, %v2140_v36 }
 0x279   : > { %527 = vrot.lane.b32.xlu0 %v525_v37, %s2016_s10 }
 0x2eb   : > { %v528_v38 = vpop.permute.xlu0 %527 }
 0x2ec   : > { %1755 = vmatmul.mubr.msk.bf16.vlgmr.msra.gmra.mrb[0].mxu0 %vm330_vm0, %v528_v38  ;;  %v1630_v38 = vld [vmem:[%s1504_s27 + $0x18] sm:$0xff] }
 0x2ed   : > { %1759 = vmatpush3.bf16.msra.mxu0 %v2094_v5  ;;  %1766 = vmatprep.mubr.msk.bf16.mxu0 %vm2014_vm1, %v2013_v0  ;;  %v777_v39 = vpack.c.bf16 %v1630_v38, %v1630_v38 }
 0x2ee   : > { %1760 = vmatprep.subr.bf16.mxu0 %v2013_v0 }
 0x2f1   : > { %1761 = vmatpush3.bf16.msra.mxu0 %v2101_v6 }
 0x2f2   : > { %1762 = vmatprep.subr.bf16.mxu0 %v2013_v0 }
 0x2f5   : > { %1763 = vmatpush3.bf16.msra.mxu0 %v2108_v7 }
 0x2f6   : > { %1764 = vmatprep.subr.bf16.mxu0 %v2013_v0 }
 0x2f9   : > { %1765 = vmatpush3.bf16.msra.mxu0 %v2117_v8 }
 0x2fa   : > { %1790 = vmatprep.subr.bf16.mxu0 %v2013_v0 }
 0x2fc   : > { %1767 = vmatmul.mubr.msk.bf16.vlgmr.msra.gmra.mrb[4].mxu0 %vm434_vm2, %v524_v40 }
 0x2fd   : > { %1791 = vmatpush3.bf16.msra.mxu0 %v2082_v1  ;;  %1794 = vmatprep.mubr.msk.bf16.mxu0 %vm2014_vm1, %v2013_v0 }
 0x2fe   : > { %1792 = vmatprep.subr.bf16.mxu0 %v2013_v0 }
 0x301   : > { %1793 = vmatpush3.bf16.msra.mxu0 %v2084_v2 }
 0x302   : > { %1798 = vmatprep.subr.bf16.mxu0 %v2013_v0 }
 0x3bf   : > { %v566_v41 = vpop.f32.mrb[0].mxu0 }
 0x3c0   : > { %v1756_v42 = vpop.f32.mrb[1].mxu0 }
 0x3c1   : > { %v569_v43 = vpop.f32.mrb[2].mxu0 }
 0x3c2   : > { %v1757_v44 = vpop.f32.mrb[3].mxu0 }
 0x3cf   : > { %v609_v45 = vpop.f32.mrb[4].mxu0 }
 0x3d0   : > { %v610_v46 = vadd.f32 %v609_v45, %v566_v41  ;;  %v1768_v47 = vpop.f32.mrb[5].mxu0 }
 0x3d1   : > { %v612_v48 = vpop.f32.mrb[6].mxu0 }
 0x3d2   : > { %v615_v49 = vadd.f32 %v2133_v15, %v610_v46  ;;  %v1769_v50 = vpop.f32.mrb[7].mxu0 }
 0x3d4   : > { %1933 = vtanh.f32 %v615_v49  ;;  %v1619_v52 = vmul.f32 -1.442695, %v615_v49 }
 0x3d6   : > { %1935 = vpow2.f32 %v1619_v52 }
 0x3de   : > { %v1934_v51 = vpop.eup %1933 }
 0x3df   : > { %625 = vrot.lane.b32.xlu1 %v1934_v51, %s2015_s9 }
 0x3e0   : > { %v1936_v53 = vpop.eup %1935 }
 0x3e1   : > { %v619_v54 = vadd.f32 1.0, %v1936_v53 }
 0x3e3   : > { %1937 = vrcp.f32 %v619_v54 }
 0x3ed   : > { %v1938_v55 = vpop.eup %1937 }
 0x3ee   : > { %v623_v58 = vmul.f32 %v1938_v55, %v506_v33 }
 0x451   : > { %v626_v56 = vpop.permute.xlu1 %625 }
 0x452   : > { %v628_v57 = vmul.f32 %v1938_v55, %v626_v56 }
 0x454   : > { %630 = vrot.lane.b32.xlu0 %v628_v57, %s2015_s9 }
 0x4c6   : > { %v631_v59 = vpop.permute.xlu0 %630 }
 0x4c7   : > { %v633_v60 = vadd.f32 %v631_v59, %v623_v58 }
 0x4c9   : > { %1939 = vtanh.f32 %v633_v60 }
 0x4d3   : > { %v1940_v61 = vpop.eup %1939 }
 0x4d4   : > { %636 = vrot.lane.b32.xlu1 %v1940_v61, %s2015_s9 }
 0x546   : > { %v637_v62 = vpop.permute.xlu1 %636 }
 0x547   : > { %v2173_v63 = vmul.f32 %v1938_v55, %v637_v62 }
 0x549   : > { %v652_v3 = vpack.c.bf16 %v2173_v63, %v2173_v63 }
 0x54b   : > { %654 = vrot.lane.b32.xlu0 %v652_v3, %s2016_s10 }
 0x5bd   : > { %v655_v4 = vpop.permute.xlu0 %654 }
 0x5be   : > { %1775 = vmatmul.mubr.msk.bf16.vlgmr.msra.gmra.mrb[8].mxu1 %vm330_vm0, %v655_v4 }
 0x5bf   : > { %1779 = vmatpush3.bf16.msra.mxu1 %v2094_v5  ;;  %1786 = vmatprep.mubr.msk.bf16.mxu1 %vm2014_vm1, %v2013_v0 }
 0x5c0   : > { %1780 = vmatprep.subr.bf16.mxu1 %v2013_v0 }
 0x5c3   : > { %1781 = vmatpush3.bf16.msra.mxu1 %v2101_v6 }
 0x5c4   : > { %1782 = vmatprep.subr.bf16.mxu1 %v2013_v0 }
 0x5c7   : > { %1783 = vmatpush3.bf16.msra.mxu1 %v2108_v7 }
 0x5c8   : > { %1784 = vmatprep.subr.bf16.mxu1 %v2013_v0 }
 0x5cb   : > { %1785 = vmatpush3.bf16.msra.mxu1 %v2117_v8 }
 0x5cc   : > { %1810 = vmatprep.subr.bf16.mxu1 %v2013_v0 }
 0x5ce   : > { %1787 = vmatmul.mubr.msk.bf16.vlgmr.msra.gmra.mrb[12].mxu1 %vm434_vm2, %v651_v10  ;;  %v903_v10 = vpack.c.bf16 %v902_v9, %v902_v9  ;;  %v1648_v9 = vld [vmem:[%s1523_s25 + $0x30] sm:$0xff]  ;;  %s1519_s25 = scalar_lea.vmem %s2364_s13, %s1640_s8 }
 0x5cf   : > { %1811 = vmatpush3.bf16.msra.mxu1 %v2082_v1  ;;  %1814 = vmatprep.mubr.msk.bf16.mxu1 %vm2014_vm1, %v2013_v0 }
 0x5d0   : > { %1812 = vmatprep.subr.bf16.mxu1 %v2013_v0 }
 0x5d3   : > { %1813 = vmatpush3.bf16.msra.mxu1 %v2084_v2 }
 0x5d4   : > { %1818 = vmatprep.subr.bf16.mxu1 %v2013_v0 }
 0x691   : > { %v693_v11 = vpop.f32.mrb[8].mxu1 }
 0x692   : > { %v1776_v12 = vpop.f32.mrb[9].mxu1 }
 0x693   : > { %v696_v13 = vpop.f32.mrb[10].mxu1 }
 0x694   : > { %v1777_v14 = vpop.f32.mrb[11].mxu1 }
 0x6a1   : > { %v736_v16 = vpop.f32.mrb[12].mxu1 }
 0x6a2   : > { %v737_v17 = vadd.f32 %v736_v16, %v693_v11  ;;  %v1788_v18 = vpop.f32.mrb[13].mxu1 }
 0x6a3   : > { %v739_v19 = vpop.f32.mrb[14].mxu1 }
 0x6a4   : > { %v742_v20 = vadd.f32 %v2133_v15, %v737_v17  ;;  %v1789_v21 = vpop.f32.mrb[15].mxu1 }
 0x6a6   : > { %1941 = vtanh.f32 %v742_v20  ;;  %v1626_v23 = vmul.f32 -1.442695, %v742_v20 }
 0x6a8   : > { %1943 = vpow2.f32 %v1626_v23 }
 0x6b0   : > { %v1942_v22 = vpop.eup %1941 }
 0x6b1   : > { %752 = vrot.lane.b32.xlu1 %v1942_v22, %s2015_s9 }
 0x6b2   : > { %v1944_v24 = vpop.eup %1943 }
 0x6b3   : > { %v746_v25 = vadd.f32 1.0, %v1944_v24 }
 0x6b5   : > { %1945 = vrcp.f32 %v746_v25 }
 0x6bf   : > { %v1946_v26 = vpop.eup %1945 }
 0x6c0   : > { %v750_v29 = vmul.f32 %v1946_v26, %v633_v60 }
 0x723   : > { %v753_v27 = vpop.permute.xlu1 %752 }
 0x724   : > { %v755_v28 = vmul.f32 %v1946_v26, %v753_v27 }
 0x726   : > { %757 = vrot.lane.b32.xlu0 %v755_v28, %s2015_s9 }
 0x798   : > { %v758_v30 = vpop.permute.xlu0 %757 }
 0x799   : > { %v760_v31 = vadd.f32 %v758_v30, %v750_v29 }
 0x79b   : > { %1947 = vtanh.f32 %v760_v31 }
 0x7a5   : > { %v1948_v32 = vpop.eup %1947 }
 0x7a6   : > { %763 = vrot.lane.b32.xlu1 %v1948_v32, %s2015_s9 }
 0x818   : > { %v764_v33 = vpop.permute.xlu1 %763 }
 0x819   : > { %v2206_v34 = vmul.f32 %v1946_v26, %v764_v33 }
 0x81b   : > { %v778_v35 = vpack.c.bf16 %v2206_v34, %v2206_v34 }
 0x81d   : > { %780 = vrot.lane.b32.xlu0 %v778_v35, %s2016_s10 }
 0x88f   : > { %v781_v37 = vpop.permute.xlu0 %780 }
 0x890   : > { %1795 = vmatmul.mubr.msk.bf16.vlgmr.msra.gmra.mrb[8].mxu0 %vm330_vm0, %v781_v37 }
 0x891   : > { %1799 = vmatpush3.bf16.msra.mxu0 %v2094_v5  ;;  %1806 = vmatprep.mubr.msk.bf16.mxu0 %vm2014_vm1, %v2013_v0 }
 0x892   : > { %1800 = vmatprep.subr.bf16.mxu0 %v2013_v0 }
 0x895   : > { %1801 = vmatpush3.bf16.msra.mxu0 %v2101_v6 }
 0x896   : > { %1802 = vmatprep.subr.bf16.mxu0 %v2013_v0 }
 0x899   : > { %1803 = vmatpush3.bf16.msra.mxu0 %v2108_v7 }
 0x89a   : > { %1804 = vmatprep.subr.bf16.mxu0 %v2013_v0 }
 0x89d   : > { %1805 = vmatpush3.bf16.msra.mxu0 %v2117_v8 }
 0x89e   : > { %1830 = vmatprep.subr.bf16.mxu0 %v2013_v0 }
 0x8a0   : > { %1807 = vmatmul.mubr.msk.bf16.vlgmr.msra.gmra.mrb[12].mxu0 %vm434_vm2, %v777_v39  ;;  %v1641_v39 = vld [vmem:[%s1515_s14 + $0x28] sm:$0xff]  ;;  %s517_s14 = scalar_lea.vmem %s2364_s13, %s1604_s28  ;;  %s1501_s28 = scalar_lea.vmem %s2364_s13, %s1622_s20 }
 0x8a1   : > { %1831 = vmatpush3.bf16.msra.mxu0 %v2082_v1  ;;  %1834 = vmatprep.mubr.msk.bf16.mxu0 %vm2014_vm1, %v2013_v0 }
 0x8a2   : > { %1832 = vmatprep.subr.bf16.mxu0 %v2013_v0 }
 0x8a5   : > { %1833 = vmatpush3.bf16.msra.mxu0 %v2084_v2 }
 0x8a6   : > { %1838 = vmatprep.subr.bf16.mxu0 %v2013_v0 }
 0x963   : > { %v819_v40 = vpop.f32.mrb[8].mxu0 }
 0x964   : > { %v1796_v41 = vpop.f32.mrb[9].mxu0 }
 0x965   : > { %v822_v42 = vpop.f32.mrb[10].mxu0 }
 0x966   : > { %v1797_v43 = vpop.f32.mrb[11].mxu0 }
 0x973   : > { %v862_v44 = vpop.f32.mrb[12].mxu0 }
 0x974   : > { %v863_v45 = vadd.f32 %v862_v44, %v819_v40  ;;  %v1808_v46 = vpop.f32.mrb[13].mxu0  ;;  %v1030_v40 = vpack.c.bf16 %v1641_v39, %v1641_v39 }
 0x975   : > { %v865_v47 = vpop.f32.mrb[14].mxu0 }
 0x976   : > { %v868_v48 = vadd.f32 %v2133_v15, %v863_v45  ;;  %v1809_v49 = vpop.f32.mrb[15].mxu0 }
 0x978   : > { %1949 = vtanh.f32 %v868_v48  ;;  %v1633_v51 = vmul.f32 -1.442695, %v868_v48 }
 0x97a   : > { %1951 = vpow2.f32 %v1633_v51 }
 0x982   : > { %v1950_v50 = vpop.eup %1949 }
 0x983   : > { %878 = vrot.lane.b32.xlu1 %v1950_v50, %s2015_s9 }
 0x984   : > { %v1952_v52 = vpop.eup %1951 }
 0x985   : > { %v872_v53 = vadd.f32 1.0, %v1952_v52 }
 0x987   : > { %1953 = vrcp.f32 %v872_v53 }
 0x991   : > { %v1954_v54 = vpop.eup %1953 }
 0x992   : > { %v876_v57 = vmul.f32 %v1954_v54, %v760_v31 }
 0x9f5   : > { %v879_v55 = vpop.permute.xlu1 %878 }
 0x9f6   : > { %v881_v56 = vmul.f32 %v1954_v54, %v879_v55 }
 0x9f8   : > { %883 = vrot.lane.b32.xlu0 %v881_v56, %s2015_s9 }
 0xa6a   : > { %v884_v58 = vpop.permute.xlu0 %883 }
 0xa6b   : > { %v886_v59 = vadd.f32 %v884_v58, %v876_v57 }
 0xa6d   : > { %1955 = vtanh.f32 %v886_v59 }
 0xa77   : > { %v1956_v60 = vpop.eup %1955 }
 0xa78   : > { %889 = vrot.lane.b32.xlu1 %v1956_v60, %s2015_s9 }
 0xaea   : > { %v890_v61 = vpop.permute.xlu1 %889 }
 0xaeb   : > { %v2239_v62 = vmul.f32 %v1954_v54, %v890_v61 }
 0xaed   : > { %v904_v3 = vpack.c.bf16 %v2239_v62, %v2239_v62 }
 0xaef   : > { %906 = vrot.lane.b32.xlu0 %v904_v3, %s2016_s10 }
 0xb61   : > { %v907_v4 = vpop.permute.xlu0 %906 }
 0xb62   : > { %1815 = vmatmul.mubr.msk.bf16.vlgmr.msra.gmra.mrb[16].mxu1 %vm330_vm0, %v907_v4 }
 0xb63   : > { %1819 = vmatpush3.bf16.msra.mxu1 %v2094_v5  ;;  %1826 = vmatprep.mubr.msk.bf16.mxu1 %vm2014_vm1, %v2013_v0 }
 0xb64   : > { %1820 = vmatprep.subr.bf16.mxu1 %v2013_v0 }
 0xb67   : > { %1821 = vmatpush3.bf16.msra.mxu1 %v2101_v6 }
 0xb68   : > { %1822 = vmatprep.subr.bf16.mxu1 %v2013_v0 }
 0xb6b   : > { %1823 = vmatpush3.bf16.msra.mxu1 %v2108_v7 }
 0xb6c   : > { %1824 = vmatprep.subr.bf16.mxu1 %v2013_v0 }
 0xb6f   : > { %1825 = vmatpush3.bf16.msra.mxu1 %v2117_v8 }
 0xb70   : > { %1850 = vmatprep.subr.bf16.mxu1 %v2013_v0 }
 0xb72   : > { %1827 = vmatmul.mubr.msk.bf16.vlgmr.msra.gmra.mrb[20].mxu1 %vm434_vm2, %v903_v10  ;;  %v1157_v10 = vpack.c.bf16 %v1648_v9, %v1648_v9 }
 0xb73   : > { %1851 = vmatpush3.bf16.msra.mxu1 %v2082_v1  ;;  %1854 = vmatprep.mubr.msk.bf16.mxu1 %vm2014_vm1, %v2013_v0 }
 0xb74   : > { %1852 = vmatprep.subr.bf16.mxu1 %v2013_v0 }
 0xb77   : > { %1853 = vmatpush3.bf16.msra.mxu1 %v2084_v2 }
 0xb78   : > { %1858 = vmatprep.subr.bf16.mxu1 %v2013_v0 }
 0xc35   : > { %v945_v11 = vpop.f32.mrb[16].mxu1 }
 0xc36   : > { %v1816_v12 = vpop.f32.mrb[17].mxu1 }
 0xc37   : > { %v948_v13 = vpop.f32.mrb[18].mxu1 }
 0xc38   : > { %v1817_v14 = vpop.f32.mrb[19].mxu1 }
 0xc45   : > { %v988_v16 = vpop.f32.mrb[20].mxu1 }
 0xc46   : > { %v989_v17 = vadd.f32 %v988_v16, %v945_v11  ;;  %v1828_v18 = vpop.f32.mrb[21].mxu1 }
 0xc47   : > { %v991_v19 = vpop.f32.mrb[22].mxu1 }
 0xc48   : > { %v994_v20 = vadd.f32 %v2133_v15, %v989_v17  ;;  %v1829_v21 = vpop.f32.mrb[23].mxu1 }
 0xc4a   : > { %1957 = vtanh.f32 %v994_v20  ;;  %v1639_v23 = vmul.f32 -1.442695, %v994_v20 }
 0xc4c   : > { %1959 = vpow2.f32 %v1639_v23 }
 0xc54   : > { %v1958_v22 = vpop.eup %1957 }
 0xc55   : > { %1004 = vrot.lane.b32.xlu1 %v1958_v22, %s2015_s9 }
 0xc56   : > { %v1960_v24 = vpop.eup %1959 }
 0xc57   : > { %v998_v25 = vadd.f32 1.0, %v1960_v24 }
 0xc59   : > { %1961 = vrcp.f32 %v998_v25 }
 0xc63   : > { %v1962_v26 = vpop.eup %1961 }
 0xc64   : > { %v1002_v29 = vmul.f32 %v1962_v26, %v886_v59 }
 0xcc7   : > { %v1005_v27 = vpop.permute.xlu1 %1004 }
 0xcc8   : > { %v1007_v28 = vmul.f32 %v1962_v26, %v1005_v27 }
 0xcca   : > { %1009 = vrot.lane.b32.xlu0 %v1007_v28, %s2015_s9 }
 0xd3c   : > { %v1010_v30 = vpop.permute.xlu0 %1009 }
 0xd3d   : > { %v1012_v31 = vadd.f32 %v1010_v30, %v1002_v29 }
 0xd3f   : > { %1963 = vtanh.f32 %v1012_v31 }
 0xd49   : > { %v1964_v32 = vpop.eup %1963 }
 0xd4a   : > { %1015 = vrot.lane.b32.xlu1 %v1964_v32, %s2015_s9 }
 0xdbc   : > { %v1016_v33 = vpop.permute.xlu1 %1015 }
 0xdbd   : > { %v2273_v35 = vmul.f32 %v1962_v26, %v1016_v33 }
 0xdbf   : > { %v1031_v37 = vpack.c.bf16 %v2273_v35, %v2273_v35 }
 0xdc1   : > { %1033 = vrot.lane.b32.xlu0 %v1031_v37, %s2016_s10 }
 0xe33   : > { %v1034_v38 = vpop.permute.xlu0 %1033 }
 0xe34   : > { %1835 = vmatmul.mubr.msk.bf16.vlgmr.msra.gmra.mrb[16].mxu0 %vm330_vm0, %v1034_v38 }
 0xe35   : > { %1839 = vmatpush3.bf16.msra.mxu0 %v2094_v5  ;;  %1846 = vmatprep.mubr.msk.bf16.mxu0 %vm2014_vm1, %v2013_v0 }
 0xe36   : > { %1840 = vmatprep.subr.bf16.mxu0 %v2013_v0 }
 0xe39   : > { %1841 = vmatpush3.bf16.msra.mxu0 %v2101_v6 }
 0xe3a   : > { %1842 = vmatprep.subr.bf16.mxu0 %v2013_v0 }
 0xe3d   : > { %1843 = vmatpush3.bf16.msra.mxu0 %v2108_v7 }
 0xe3e   : > { %1844 = vmatprep.subr.bf16.mxu0 %v2013_v0 }
 0xe41   : > { %1845 = vmatpush3.bf16.msra.mxu0 %v2117_v8 }
 0xe42   : > { %1870 = vmatprep.subr.bf16.mxu0 %v2013_v0 }
 0xe44   : > { %1847 = vmatmul.mubr.msk.bf16.vlgmr.msra.gmra.mrb[20].mxu0 %vm434_vm2, %v1030_v40  ;;  %v1655_v40 = vld [vmem:[%s1531_s5 + $0x38] sm:$0xff] }
 0xe45   : > { %1871 = vmatpush3.bf16.msra.mxu0 %v2082_v1  ;;  %1874 = vmatprep.mubr.msk.bf16.mxu0 %vm2014_vm1, %v2013_v0 }
 0xe46   : > { %1872 = vmatprep.subr.bf16.mxu0 %v2013_v0 }
 0xe49   : > { %1873 = vmatpush3.bf16.msra.mxu0 %v2084_v2 }
 0xe4a   : > { %1878 = vmatprep.subr.bf16.mxu0 %v2013_v0 }
 0xf07   : > { %v1072_v41 = vpop.f32.mrb[16].mxu0 }
 0xf08   : > { %v1836_v42 = vpop.f32.mrb[17].mxu0 }
 0xf09   : > { %v1075_v43 = vpop.f32.mrb[18].mxu0 }
 0xf0a   : > { %v1837_v44 = vpop.f32.mrb[19].mxu0 }
 0xf17   : > { %v1115_v45 = vpop.f32.mrb[20].mxu0 }
 0xf18   : > { %v1116_v46 = vadd.f32 %v1115_v45, %v1072_v41  ;;  %v1848_v47 = vpop.f32.mrb[21].mxu0 }
 0xf19   : > { %v1118_v48 = vpop.f32.mrb[22].mxu0 }
 0xf1a   : > { %v1121_v49 = vadd.f32 %v2133_v15, %v1116_v46  ;;  %v1849_v1 = vpop.f32.mrb[23].mxu0 }
 0xf1c   : > { %1965 = vtanh.f32 %v1121_v49  ;;  %v1644_v51 = vmul.f32 -1.442695, %v1121_v49 }
 0xf1e   : > { %1967 = vpow2.f32 %v1644_v51 }
 0xf26   : > { %v1966_v50 = vpop.eup %1965 }
 0xf27   : > { %1131 = vrot.lane.b32.xlu1 %v1966_v50, %s2015_s9 }
 0xf28   : > { %v1968_v2 = vpop.eup %1967 }
 0xf29   : > { %v1125_v52 = vadd.f32 1.0, %v1968_v2 }
 0xf2b   : > { %1969 = vrcp.f32 %v1125_v52 }
 0xf35   : > { %v1970_v53 = vpop.eup %1969 }
 0xf36   : > { %v1129_v56 = vmul.f32 %v1970_v53, %v1012_v31 }
 0xf99   : > { %v1132_v54 = vpop.permute.xlu1 %1131 }
 0xf9a   : > { %v1134_v55 = vmul.f32 %v1970_v53, %v1132_v54 }
 0xf9c   : > { %1136 = vrot.lane.b32.xlu0 %v1134_v55, %s2015_s9 }
0x100e   : > { %v1137_v57 = vpop.permute.xlu0 %1136 }
0x100f   : > { %v1139_v58 = vadd.f32 %v1137_v57, %v1129_v56 }
0x1011   : > { %1971 = vtanh.f32 %v1139_v58 }
0x101b   : > { %v1972_v59 = vpop.eup %1971 }
0x101c   : > { %1142 = vrot.lane.b32.xlu1 %v1972_v59, %s2015_s9 }
0x108e   : > { %v1143_v60 = vpop.permute.xlu1 %1142 }
0x108f   : > { %v2306_v61 = vmul.f32 %v1970_v53, %v1143_v60 }
0x1091   : > { %v1158_v3 = vpack.c.bf16 %v2306_v61, %v2306_v61 }
0x1093   : > { %1160 = vrot.lane.b32.xlu0 %v1158_v3, %s2016_s10 }
0x1105   : > { %v1161_v4 = vpop.permute.xlu0 %1160 }
0x1106   : > { %1855 = vmatmul.mubr.msk.bf16.vlgmr.msra.gmra.mrb[24].mxu1 %vm330_vm0, %v1161_v4 }
0x1107   : > { %1859 = vmatpush3.bf16.msra.mxu1 %v2094_v5  ;;  %1866 = vmatprep.mubr.msk.bf16.mxu1 %vm2014_vm1, %v2013_v0 }
0x1108   : > { %1860 = vmatprep.subr.bf16.mxu1 %v2013_v0 }
0x110b   : > { %1861 = vmatpush3.bf16.msra.mxu1 %v2101_v6 }
0x110c   : > { %1862 = vmatprep.subr.bf16.mxu1 %v2013_v0 }
0x110f   : > { %1863 = vmatpush3.bf16.msra.mxu1 %v2108_v7 }
0x1110   : > { %1864 = vmatprep.subr.bf16.mxu1 %v2013_v0 }
0x1113   : > { %1865 = vmatpush3.bf16.msra.mxu1 %v2117_v8 }
0x1116   : > { %1867 = vmatmul.mubr.msk.bf16.vlgmr.msra.gmra.mrb[28].mxu1 %vm434_vm2, %v1157_v10 }
0x11d9   : > { %v1199_v11 = vpop.f32.mrb[24].mxu1 }
0x11da   : > { %v1856_v12 = vpop.f32.mrb[25].mxu1 }
0x11db   : > { %v1202_v13 = vpop.f32.mrb[26].mxu1 }
0x11dc   : > { %v1857_v14 = vpop.f32.mrb[27].mxu1 }
0x11e9   : > { %v1242_v16 = vpop.f32.mrb[28].mxu1 }
0x11ea   : > { %v1243_v17 = vadd.f32 %v1242_v16, %v1199_v11  ;;  %v1868_v18 = vpop.f32.mrb[29].mxu1 }
0x11eb   : > { %v1245_v19 = vpop.f32.mrb[30].mxu1 }
0x11ec   : > { %v1248_v20 = vadd.f32 %v2133_v15, %v1243_v17  ;;  %v1869_v21 = vpop.f32.mrb[31].mxu1 }
0x11ee   : > { %1973 = vtanh.f32 %v1248_v20  ;;  %v1651_v23 = vmul.f32 -1.442695, %v1248_v20 }
0x11f0   : > { %1975 = vpow2.f32 %v1651_v23 }
0x11f8   : > { %v1974_v22 = vpop.eup %1973 }
0x11f9   : > { %1258 = vrot.lane.b32.xlu1 %v1974_v22, %s2015_s9 }
0x11fa   : > { %v1976_v24 = vpop.eup %1975 }
0x11fb   : > { %v1252_v25 = vadd.f32 1.0, %v1976_v24 }
0x11fd   : > { %1977 = vrcp.f32 %v1252_v25 }
0x1207   : > { %v1978_v26 = vpop.eup %1977 }
0x1208   : > { %v1256_v29 = vmul.f32 %v1978_v26, %v1139_v58 }
0x126b   : > { %v1259_v27 = vpop.permute.xlu1 %1258 }
0x126c   : > { %v1261_v28 = vmul.f32 %v1978_v26, %v1259_v27 }
0x126e   : > { %1263 = vrot.lane.b32.xlu0 %v1261_v28, %s2015_s9 }
0x12e0   : > { %v1264_v30 = vpop.permute.xlu0 %1263 }
0x12e1   : > { %v1266_v31 = vadd.f32 %v1264_v30, %v1256_v29 }
0x12e3   : > { %1979 = vtanh.f32 %v1266_v31 }
0x12ed   : > { %v1980_v32 = vpop.eup %1979 }
0x12ee   : > { %1269 = vrot.lane.b32.xlu1 %v1980_v32, %s2015_s9 }
0x1360   : > { %v1270_v33 = vpop.permute.xlu1 %1269 }
0x1361   : > { %v1272_v37 = vmul.f32 %v1978_v26, %v1270_v33 }
0x1363   : > { %v1285_v38 = vpack.c.bf16 %v1272_v37, %v1272_v37 }
0x1365   : > { %1287 = vrot.lane.b32.xlu0 %v1285_v38, %s2016_s10 }
0x13d7   : > { %v1288_v39 = vpop.permute.xlu0 %1287 }
0x13d8   : > { %1875 = vmatmul.mubr.msk.bf16.vlgmr.msra.gmra.mrb[24].mxu0 %vm330_vm0, %v1288_v39 }
0x13d9   : > { %1879 = vmatpush3.bf16.msra.mxu0 %v2094_v5  ;;  %1886 = vmatprep.mubr.msk.bf16.mxu0 %vm2014_vm1, %v2013_v0  ;;  %v1284_v5 = vpack.c.bf16 %v1655_v40, %v1655_v40 }
0x13da   : > { %1880 = vmatprep.subr.bf16.mxu0 %v2013_v0 }
0x13dd   : > { %1881 = vmatpush3.bf16.msra.mxu0 %v2101_v6 }
0x13de   : > { %1882 = vmatprep.subr.bf16.mxu0 %v2013_v0 }
0x13e1   : > { %1883 = vmatpush3.bf16.msra.mxu0 %v2108_v7 }
0x13e2   : > { %1884 = vmatprep.subr.bf16.mxu0 %v2013_v0 }
0x13e5   : > { %1885 = vmatpush3.bf16.msra.mxu0 %v2117_v8 }
0x13e8   : > { %1887 = vmatmul.mubr.msk.bf16.vlgmr.msra.gmra.mrb[28].mxu0 %vm434_vm2, %v1284_v5 }
0x14ab   : > { %v1326_v41 = vpop.f32.mrb[24].mxu0 }
0x14ac   : > { %v1876_v42 = vpop.f32.mrb[25].mxu0 }
0x14ad   : > { %v1329_v6 = vpop.f32.mrb[26].mxu0 }
0x14ae   : > { %v1877_v43 = vpop.f32.mrb[27].mxu0 }
0x14bb   : > { %v1369_v44 = vpop.f32.mrb[28].mxu0 }
0x14bc   : > { %v1370_v45 = vadd.f32 %v1369_v44, %v1326_v41  ;;  %v1888_v46 = vpop.f32.mrb[29].mxu0 }
0x14bd   : > { %v1372_v47 = vpop.f32.mrb[30].mxu0 }
0x14be   : > { %v1375_v48 = vadd.f32 %v2133_v15, %v1370_v45  ;;  %v1889_v49 = vpop.f32.mrb[31].mxu0 }
0x14c0   : > { %1981 = vtanh.f32 %v1375_v48  ;;  %v1658_v0 = vmul.f32 -1.442695, %v1375_v48 }
0x14c2   : > { %1983 = vpow2.f32 %v1658_v0 }
0x14ca   : > { %v1982_v7 = vpop.eup %1981 }
0x14cb   : > { %1385 = vrot.lane.b32.xlu1 %v1982_v7, %s2015_s9 }
0x14cc   : > { %v1984_v8 = vpop.eup %1983 }
0x14cd   : > { %v1379_v1 = vadd.f32 1.0, %v1984_v8 }
0x14cf   : > { %1985 = vrcp.f32 %v1379_v1 }
0x14d9   : > { %v1986_v50 = vpop.eup %1985 }
0x14da   : > { %v1383_v15 = vmul.f32 %v1986_v50, %v1266_v31 }
0x153d   : > { %v1386_v51 = vpop.permute.xlu1 %1385 }
0x153e   : > { %v1388_v2 = vmul.f32 %v1986_v50, %v1386_v51 }
0x1540   : > { %1390 = vrot.lane.b32.xlu0 %v1388_v2, %s2015_s9 }
0x1544   : > { %514 = vrot.lane.b32.xlu0 %v2140_v36, %s2016_s10 }
0x1548   : > { %768 = vrot.lane.b32.xlu0 %v2206_v34, %s2016_s10 }
0x154c   : > { %1020 = vrot.lane.b32.xlu0 %v2273_v35, %s2016_s10 }
0x1550   : > { %1274 = vrot.lane.b32.xlu0 %v1272_v37, %s2016_s10 }
0x15b2   : > { %v1391_v52 = vpop.permute.xlu0 %1390 }
0x15b3   : > { %v1393_v53 = vadd.f32 %v1391_v52, %v1383_v15 }
0x15b5   : > { %1987 = vtanh.f32 %v1393_v53  ;;  %1408 = vrot.lane.b32.xlu0 %v1393_v53, %s2017_s22 }
0x15b6   : > { %v515_v36 = vpop.permute.xlu0 %514 }
0x15b7   : > { %518 = vst.msk [vmem:[%s517_s14] sm:$0xff] %vm330_vm0, %v515_v36 }
0x15ba   : > { %v769_v35 = vpop.permute.xlu0 %768 }
0x15be   : > { %v1021_v54 = vpop.permute.xlu0 %1020 }
0x15bf   : > { %v1988_v34 = vpop.eup %1987 }
0x15c0   : > { %1396 = vrot.lane.b32.xlu1 %v1988_v34, %s2015_s9  ;;  %s1507_s9 = scalar_lea.vmem %s2364_s13, %s1629_s24 }
0x15c2   : > { %v1275_v55 = vpop.permute.xlu0 %1274 }
0x15c4   : > { %641 = vrot.lane.b32.xlu1 %v2173_v63, %s2016_s10 }
0x15c8   : > { %894 = vrot.lane.b32.xlu1 %v2239_v62, %s2016_s10 }
0x15cc   : > { %1147 = vrot.lane.b32.xlu1 %v2306_v61, %s2016_s10 }
0x1627   : > { %v1409_v56 = vpop.permute.xlu0 %1408 }
0x1628   : > { %1411 = vst.msk [vmem:[#allocation3] sm:$0xff] %vm330_vm0, %v1409_v56 }
0x1632   : > { %v1397_v57 = vpop.permute.xlu1 %1396 }
0x1633   : > { %v1399_v63 = vmul.f32 %v1986_v50, %v1397_v57 }
0x1635   : > { %1401 = vrot.lane.b32.xlu1 %v1399_v63, %s2016_s10  ;;  %s1535_s10 = scalar_lea.vmem %s2364_s13, %s1654_s26 }
0x1636   : > { %v642_v62 = vpop.permute.xlu1 %641 }
0x1637   : > { %1621 = vst.msk [vmem:[%s1493_s19 + $0x8] sm:$0xff] %vm330_vm0, %v642_v62 }
0x1638   : > { %1628 = vst.msk [vmem:[%s1501_s28 + $0x10] sm:$0xff] %vm330_vm0, %v769_v35 }
0x163a   : > { %v895_v58 = vpop.permute.xlu1 %894 }
0x163b   : > { %1635 = vst.msk [vmem:[%s1507_s9 + $0x18] sm:$0xff] %vm330_vm0, %v895_v58 }
0x163c   : > { %1024 = vst.msk [vmem:[%s1023_s23] sm:$0xff] %vm330_vm0, %v1021_v54 }
0x163e   : > { %v1148_v59 = vpop.permute.xlu1 %1147 }
0x163f   : > { %1646 = vst.msk [vmem:[%s1519_s25 + $0x28] sm:$0xff] %vm330_vm0, %v1148_v59 }
0x1640   : > { %1653 = vst.msk [vmem:[%s1527_s11 + $0x30] sm:$0xff] %vm330_vm0, %v1275_v55 }
0x16a7   : > { %v1402_v60 = vpop.permute.xlu1 %1401 }
0x16a8   : > { %1660 = vst.msk [vmem:[%s1535_s10 + $0x38] sm:$0xff] %vm330_vm0, %v1402_v60  ;;  %1406 = vst.msk [vmem:[#allocation2] sm:$0xff] %vm330_vm0, %v1402_v60 }
0x16a9 PF: > { %s14_s17 = sadd.s32 1, %s2011_s17   ;;  %s2421_s15 = smov %s2007_s16 }
0x16aa   : > { %p11_p5 = scmp.ge.s32.totalorder %s14_s17, 4   ;;  %s2422_s16 = smov %s2424_s18 }
0x16ac   :  { %13 = sbr.rel (!%p11_p5) target bundleno = 2 (0x2), region = 95 }

</bundles_post_ra>
